<compile_context>
chip_gen: v6e
topology: v6e:2x2x1
jax: 0.10.0
libtpu: 0.0.40
codegen_flags: <defaults>
</compile_context>

<pallas_src>
import functools

import jax
import jax.numpy as jnp
from jax.experimental import pallas as pl
from jax.experimental.pallas import tpu as pltpu

PRIMITIVES = ("none", "skip_connect", "conv_3x3", "avg_pool_3x3", "max_pool_3x3")
N_OPS = len(PRIMITIVES)
N_NODES = 4
GEOM_ROWS = 24          # 9 validity + 1 inv-count + 9 max-bias rows, padded to 24 sublanes
BIG = 1e30              # finite "-inf" sentinel used by the max-pool bias rows


# ----------------------------------------------------------------------------
# Pallas kernel: one grid step = one SOURCE state; emits every edge leaving it.
# ----------------------------------------------------------------------------
def _cell_kernel(mix_ref,                         # scalar prefetch (SMEM)
                 x_ref, geom_ref, w_ref,          # inputs (VMEM blocks)
                 out_ref,                         # output (VMEM, resident over sources)
                 pmat_ref, state_ref,             # scratch
                 *, img_w, n_nodes, mxu_dtype):
    """
    mix_ref  : (n_nodes*n_nodes*N_OPS,) f32  softmaxed arch weights, flat [src, dst, op]
    x_ref    : (C, P)              f32  input slab, P = pixels on the lane axis
    geom_ref : (24, P)             f32  rows 0..8 tap validity (0/1), row 9 = 1/count,
                                        rows 10..18 = (valid-1)*BIG max-pool bias
    w_ref    : (1, n_nodes*C, 9C)  mxu_dtype  conv weights of all edges leaving this
                                        source; row block d holds edge (src -> node d)
    out_ref  : (n_nodes, C, P)     f32  node outputs (accumulated in place)
    pmat_ref : (9C, P)             f32  im2col scratch, built once per source
    state_ref: (C, P)              f32  current source state
    """
    s = pl.program_id(1)
    c, p = x_ref.shape

    # Source state: input x for s == 0, otherwise node s-1 (already final, since
    # edges are processed source-major and node s-1 only receives from sources < s).
    @pl.when(s == 0)
    def _state_from_input():
        state_ref[...] = x_ref[...]

    @pl.when(s != 0)
    def _state_from_node():
        state_ref[...] = out_ref[jnp.maximum(s - 1, 0)]

    state = state_ref[...]

    # In-kernel im2col (once per source): 9 lane-rolled copies masked by the
    # precomputed validity rows, written straight into the (9C, P) scratch.
    # Circular wrap across rows / images always lands on masked positions.
    ssum = jnp.zeros((c, p), jnp.float32)
    smax = jnp.full((c, p), -BIG, jnp.float32)
    for k in range(9):                                    # static unroll (3x3 window)
        kh, kw = k // 3, k % 3
        d = (kh - 1) * img_w + (kw - 1)                   # flat pixel offset of tap k
        shifted = state if d == 0 else pltpu.roll(state, shift=(-d) % p, axis=1)
        vmask = geom_ref[pl.ds(k, 1), :]                  # (1, P) 0/1
        bias = geom_ref[pl.ds(10 + k, 1), :]              # (1, P) 0 / -BIG
        tap = shifted * vmask                             # zero-padding semantics
        pmat_ref[pl.ds(k * c, c), :] = tap
        ssum = ssum + tap
        smax = jnp.maximum(smax, shifted + bias)          # additive bias, no select
    avg = ssum * geom_ref[pl.ds(9, 1), :]                 # count_include_pad=False

    # One MXU matmul per source: (n_nodes*C, 9C) x (9C, P) -> conv of every edge.
    lhs = w_ref[0]
    rhs = pmat_ref[...]
    if jnp.dtype(mxu_dtype) != jnp.dtype(jnp.float32):    # bf16 operands, f32 accumulate
        rhs = rhs.astype(mxu_dtype)
    conv_all = jnp.dot(lhs, rhs, preferred_element_type=jnp.float32)   # (n_nodes*C, P)

    # Mix and scatter into every destination node downstream of this source.
    for dst in range(n_nodes):
        @pl.when(s <= dst)                                # edge (s -> dst) exists
        def _edge(dst=dst):
            base = (s * n_nodes + dst) * N_OPS
            conv = conv_all[dst * c:(dst + 1) * c, :]
            # PRIMITIVES[0] == 'none' contributes zeros; mix_ref[base + 0] unused.
            mixed = (mix_ref[base + 1] * state             # skip_connect
                     + mix_ref[base + 2] * conv            # conv_3x3
                     + mix_ref[base + 3] * avg             # avg_pool_3x3
                     + mix_ref[base + 4] * smax)           # max_pool_3x3

            @pl.when(s == 0)                               # first edge into every node
            def _write():
                out_ref[dst] = mixed

            @pl.when(s != 0)
            def _accumulate():
                out_ref[dst] = out_ref[dst] + mixed


# ----------------------------------------------------------------------------
# Host-side packing helpers (plain JAX, traced once under jit).
# ----------------------------------------------------------------------------
def _make_geometry(imgs_per_tile, h, w):
    """(24, imgs_per_tile*h*w) geometry slab (identical for every batch tile)."""
    hh = jnp.arange(h)
    ww = jnp.arange(w)
    rows = []
    for kh in range(3):
        for kw in range(3):
            vh = ((hh + kh - 1) >= 0) & ((hh + kh - 1) < h)
            vw = ((ww + kw - 1) >= 0) & ((ww + kw - 1) < w)
            rows.append((vh[:, None] & vw[None, :]).astype(jnp.float32).reshape(-1))
    valid = jnp.stack(rows, axis=0)                               # (9, h*w)
    inv_cnt = 1.0 / jnp.sum(valid, axis=0, keepdims=True)         # (1, h*w)
    bias = (valid - 1.0) * BIG                                    # (9, h*w)
    pad = jnp.zeros((GEOM_ROWS - 19, h * w), jnp.float32)
    g = jnp.concatenate([valid, inv_cnt, bias, pad], axis=0)      # (24, h*w)
    return jnp.tile(g, (1, imgs_per_tile))                        # (24, p_tile)


def _pack_conv_weights(conv_w, n_nodes, mxu_dtype):
    """(E, 9, Cin, Cout) -> (n_nodes src, n_nodes*Cout, 9*Cin) source-major stack.

    stack[s, d*C + co, k*C + ci] = conv_w[edge(s,d), k, ci, co]; node blocks with
    no edge (d < s) stay zero, so one matmul per source yields every edge's conv.
    """
    e_tot, k9, c, _ = conv_w.shape
    w_t = jnp.transpose(conv_w, (0, 3, 1, 2)).reshape(e_tot, c, k9 * c)
    stack = jnp.zeros((n_nodes, n_nodes * c, k9 * c), jnp.float32)
    e = 0
    for dst in range(n_nodes):
        for src in range(dst + 1):
            stack = stack.at[src, dst * c:(dst + 1) * c, :].set(w_t[e])
            e += 1
    return stack.astype(mxu_dtype)


def _mix_table(weights_normal, n_nodes):
    """(n_edges, N_OPS) dst-major -> flat (n_nodes*n_nodes*N_OPS,) [src, dst, op]."""
    tab = jnp.zeros((n_nodes, n_nodes, N_OPS), jnp.float32)
    e = 0
    for dst in range(n_nodes):
        for src in range(dst + 1):
            tab = tab.at[src, dst].set(weights_normal[e].astype(jnp.float32))
            e += 1
    return tab.reshape(-1)


def _vmem_estimate(c, p_tile, n_nodes, mxu_bytes):
    """Rough per-tile VMEM working set (bytes) for tiling / limit decisions."""
    f32 = 4
    est = 2 * c * p_tile * f32                  # x block (double-buffer headroom)
    est += 2 * GEOM_ROWS * p_tile * f32         # geometry block
    est += 2 * n_nodes * c * 9 * c * mxu_bytes  # weight block
    est += 2 * n_nodes * c * p_tile * f32       # resident output block
    est += 9 * c * p_tile * f32                 # im2col scratch
    est += c * p_tile * f32                     # state scratch
    est += (n_nodes + 6) * c * p_tile * f32     # live temporaries (ssum/smax/avg/conv/mixed)
    return est


def search_cnn_forward(x_nchw, weights_normal, conv_w, *,
                       imgs_per_tile=None, mxu_dtype=jnp.bfloat16):
    """Pallas implementation of SearchCNN.forward (single SearchCell).

    x_nchw         : (N, C, H, W)
    weights_normal : (n_edges, N_OPS)   softmaxed architecture weights (flattened)
    conv_w         : (n_edges, 9, C, C) 3x3 conv weights [edge, tap, c_in, c_out]
    imgs_per_tile  : images per batch tile (lane width = imgs_per_tile*H*W).  The
                     default auto-fits a ~48 MiB VMEM budget (v7x-safe), keeps the
                     lane tile a multiple of 128 when split, and prefers >= 2 tiles
                     so both v7x TensorCores get work.
    mxu_dtype      : dtype of MXU operands (bf16 recommended on v6e/v7x; f32 kept
                     available for strict numerics).  Accumulation is always f32.
    """
    x = x_nchw.astype(jnp.float32)
    n, c, h, w = x.shape
    p = n * h * w
    n_edges = N_NODES * (N_NODES + 1) // 2
    assert weights_normal.shape == (n_edges, N_OPS), weights_normal.shape
    assert conv_w.shape == (n_edges, 9, c, c), conv_w.shape
    mxu_bytes = jnp.dtype(mxu_dtype).itemsize

    if imgs_per_tile is None:
        budget = 48 * 1024 * 1024       # fits v7x (64 MiB physical); v5e/v6e have 128 MiB
        imgs_per_tile = 1
        for cand in range(n, 0, -1):
            if n % cand:
                continue
            pt = cand * h * w
            if n // cand > 1 and pt % 128 != 0:
                continue                # keep lane-dense (unmasked) stores when tiled
            if _vmem_estimate(c, pt, N_NODES, mxu_bytes) <= budget:
                imgs_per_tile = cand
                break
        # v7x megacore: give the second TensorCore a batch tile when it is free to.
        if (imgs_per_tile == n and n % 2 == 0
                and ((n // 2) * h * w) % 128 == 0):
            imgs_per_tile = n // 2

    assert n % imgs_per_tile == 0, (n, imgs_per_tile)
    n_b = n // imgs_per_tile
    p_tile = imgs_per_tile * h * w
    assert n_b == 1 or p_tile % 128 == 0, "tile lane width must be a multiple of 128"

    # TODO(synk): if the downstream consumer accepts the lane-dense (node, C, pixel)
    # layout, the input transpose here and the output transpose below (one HBM pass
    # each) can be dropped.
    x_t = jnp.transpose(x, (1, 0, 2, 3)).reshape(c, p)        # (C, P): pixels on lanes
    geom = _make_geometry(imgs_per_tile, h, w)                # (24, p_tile), same every tile
    w_stack = _pack_conv_weights(conv_w, N_NODES, mxu_dtype)  # (n_nodes, n_nodes*C, 9C)
    mix = _mix_table(weights_normal, N_NODES)                 # (n_nodes*n_nodes*N_OPS,)

    vmem_limit = int(min(max(2 * _vmem_estimate(c, p_tile, N_NODES, mxu_bytes),
                             32 * 1024 * 1024), 64 * 1024 * 1024))

    grid_spec = pltpu.PrefetchScalarGridSpec(
        num_scalar_prefetch=1,                                # mix table -> SMEM
        grid=(n_b, N_NODES),                                  # (batch tiles, sources)
        in_specs=[
            pl.BlockSpec((c, p_tile), lambda b, s, m: (0, b)),
            pl.BlockSpec((GEOM_ROWS, p_tile), lambda b, s, m: (0, 0)),
            pl.BlockSpec((1, N_NODES * c, 9 * c), lambda b, s, m: (s, 0, 0)),
        ],
        out_specs=pl.BlockSpec((N_NODES, c, p_tile), lambda b, s, m: (0, 0, b)),
        scratch_shapes=[pltpu.VMEM((9 * c, p_tile), jnp.float32),
                        pltpu.VMEM((c, p_tile), jnp.float32)],
    )
    out_t = pl.pallas_call(
        functools.partial(_cell_kernel, img_w=w, n_nodes=N_NODES, mxu_dtype=mxu_dtype),
        out_shape=jax.ShapeDtypeStruct((N_NODES, c, p), jnp.float32),
        grid_spec=grid_spec,
        compiler_params=pltpu.CompilerParams(
            dimension_semantics=("parallel", "arbitrary"),
            vmem_limit_bytes=vmem_limit),
    )(mix, x_t, geom, w_stack)

    # (n_nodes, C, N*H*W) -> NCHW with channel = node*C + c (concat over nodes).
    out = out_t.reshape(N_NODES, c, n, h, w)
    return jnp.transpose(out, (2, 0, 1, 3, 4)).reshape(n, N_NODES * c, h, w)


# ----------------------------------------------------------------------------
# Pure-JAX reference (same semantics) for the correctness check.
# ----------------------------------------------------------------------------
def _ref_mixed_op(x, mw, cw):
    n, h, w, c = x.shape
    xp = jnp.pad(x, ((0, 0), (1, 1), (1, 1), (0, 0)))
    mp = jnp.pad(jnp.ones((n, h, w, 1), jnp.float32), ((0, 0), (1, 1), (1, 1), (0, 0)))
    conv = jnp.zeros_like(x)
    ssum = jnp.zeros_like(x)
    cnt = jnp.zeros((n, h, w, 1), jnp.float32)
    smax = jnp.full_like(x, -jnp.inf)
    for kh in range(3):
        for kw in range(3):
            win = xp[:, kh:kh + h, kw:kw + w, :]
            mk = mp[:, kh:kh + h, kw:kw + w, :]
            conv = conv + jnp.einsum("nhwc,cd->nhwd", win, cw[kh * 3 + kw],
                                     precision=jax.lax.Precision.HIGHEST)
            ssum = ssum + win
            cnt = cnt + mk
            smax = jnp.maximum(smax, jnp.where(mk > 0, win, -jnp.inf))
    return mw[1] * x + mw[2] * conv + mw[3] * (ssum / cnt) + mw[4] * smax


def ref_forward(x_nchw, weights_normal, conv_w):
    x = jnp.transpose(x_nchw, (0, 2, 3, 1)).astype(jnp.float32)
    states = [x]
    edge = 0
    for _ in range(N_NODES):
        n_prev = len(states)
        node = jnp.zeros_like(x)
        for j in range(n_prev):
            node = node + _ref_mixed_op(states[j], weights_normal[edge + j],
                                        conv_w[edge + j])
        states.append(node)
        edge += n_prev
    out = jnp.concatenate(states[1:], axis=-1)
    return jnp.transpose(out, (0, 3, 1, 2))


if __name__ == "__main__":
    key = jax.random.PRNGKey(0)
    kx, ka, kw = jax.random.split(key, 3)

    N, C, H, W = 2, 8, 16, 16
    n_edges = N_NODES * (N_NODES + 1) // 2      # 10 edges for n_nodes=4

    # Deterministic synthetic inputs / parameters.
    x = jax.random.normal(kx, (N, C, H, W), jnp.float32)                 # NCHW input
    alphas = jax.random.normal(ka, (n_edges, N_OPS), jnp.float32)
    weights_normal = jax.nn.softmax(alphas, axis=-1)                     # arch weights
    conv_w = 0.1 * jax.random.normal(kw, (n_edges, 9, C, C), jnp.float32)

    ref = ref_forward(x, weights_normal, conv_w)

    # Strict check with f32 MXU operands.
    fwd_f32 = jax.jit(functools.partial(search_cnn_forward, mxu_dtype=jnp.float32))
    out = jax.block_until_ready(fwd_f32(x, weights_normal, conv_w))
    assert out.shape == (N, N_NODES * C, H, W), out.shape
    err = float(jnp.max(jnp.abs(out - ref)))
    assert jnp.allclose(out, ref, rtol=2e-3, atol=2e-3), err

    # Fast-path smoke check: bf16 MXU operands, f32 accumulation (v6e/v7x path).
    fwd_bf16 = jax.jit(functools.partial(search_cnn_forward, mxu_dtype=jnp.bfloat16))
    out_bf = jax.block_until_ready(fwd_bf16(x, weights_normal, conv_w))
    err_bf = float(jnp.max(jnp.abs(out_bf - ref)))
    assert jnp.allclose(out_bf, ref, rtol=5e-2, atol=5e-2), err_bf

    print("KERNEL_OK")
</pallas_src>

<mosaic_0001>
module attributes {stable_mosaic.version = 11 : i64} {
  func.func @_cell_kernel(%arg0: i32, %arg1: i32, %arg2: memref<80xf32, #tpu.memory_space<smem>>, %arg3: memref<8x256xf32, #tpu.memory_space<vmem>>, %arg4: memref<24x256xf32, #tpu.memory_space<vmem>>, %arg5: memref<1x32x72xf32, #tpu.memory_space<vmem>>, %arg6: memref<4x8x256xf32, #tpu.memory_space<vmem>>, %arg7: memref<72x256xf32, #tpu.memory_space<vmem>>, %arg8: memref<8x256xf32, #tpu.memory_space<vmem>>) attributes {dimension_semantics = [#tpu.dimension_semantics<parallel>, #tpu.dimension_semantics<arbitrary>], iteration_bounds = array<i64: 2, 4>, scalar_prefetch = 1 : i64, scratch_operands = 2 : i64, tpu.core_type = #tpu.core_type<tc>, window_params = [{transform_indices = @transform_0, window_bounds = array<i64: 8, 256>}, {pipeline_mode = #tpu.pipeline_mode<synchronous>, transform_indices = @transform_1, window_bounds = array<i64: 24, 256>}, {transform_indices = @transform_2, window_bounds = array<i64: 1, 32, 72>}, {transform_indices = @transform_3, window_bounds = array<i64: 4, 8, 256>}]} {
    %c0_i32 = arith.constant 0 : i32
    %0 = arith.cmpi eq, %arg1, %c0_i32 : i32
    %1 = arith.extui %0 : i1 to i32
    %c0_i32_0 = arith.constant 0 : i32
    %2 = arith.cmpi ne, %1, %c0_i32_0 : i32
    scf.if %2 {
      %c0_49 = arith.constant 0 : index
      %c0_50 = arith.constant 0 : index
      %117 = vector.load %arg3[%c0_49, %c0_50] : memref<8x256xf32, #tpu.memory_space<vmem>>, vector<8x256xf32>
      %c0_51 = arith.constant 0 : index
      %c0_52 = arith.constant 0 : index
      %118 = vector.load %arg8[%c0_51, %c0_52] : memref<8x256xf32, #tpu.memory_space<vmem>>, vector<8x256xf32>
      tpu.vector_store %arg8[%c0_51, %c0_52], %117 {strides = array<i32>} : memref<8x256xf32, #tpu.memory_space<vmem>>, vector<8x256xf32>,
    } else {
    }
    %c0_i32_1 = arith.constant 0 : i32
    %3 = arith.cmpi ne, %arg1, %c0_i32_1 : i32
    %4 = arith.extui %3 : i1 to i32
    %c0_i32_2 = arith.constant 0 : i32
    %5 = arith.cmpi ne, %4, %c0_i32_2 : i32
    scf.if %5 {
      %c1_i32_49 = arith.constant 1 : i32
      %117 = arith.subi %arg1, %c1_i32_49 : i32
      %c0_i32_50 = arith.constant 0 : i32
      %118 = arith.maxsi %117, %c0_i32_50 : i32
      %119 = arith.index_cast %118 : i32 to index
      %c0_51 = arith.constant 0 : index
      %c0_52 = arith.constant 0 : index
      %120 = vector.load %arg6[%119, %c0_51, %c0_52] : memref<4x8x256xf32, #tpu.memory_space<vmem>>, vector<1x8x256xf32>
      %121 = vector.shape_cast %120 : vector<1x8x256xf32> to vector<8x256xf32>
      %c0_53 = arith.constant 0 : index
      %c0_54 = arith.constant 0 : index
      %122 = vector.load %arg8[%c0_53, %c0_54] : memref<8x256xf32, #tpu.memory_space<vmem>>, vector<8x256xf32>
      tpu.vector_store %arg8[%c0_53, %c0_54], %121 {strides = array<i32>} : memref<8x256xf32, #tpu.memory_space<vmem>>, vector<8x256xf32>,
    } else {
    }
    %c0 = arith.constant 0 : index
    %c0_3 = arith.constant 0 : index
    %6 = vector.load %arg8[%c0, %c0_3] : memref<8x256xf32, #tpu.memory_space<vmem>>, vector<8x256xf32>
    %cst = arith.constant 0.000000e+00 : f32
    %7 = vector.broadcast %cst : f32 to vector<8x256xf32>
    %cst_4 = arith.constant -1.000000e+30 : f32
    %8 = vector.broadcast %cst_4 : f32 to vector<8x256xf32>
    %c17_i32 = arith.constant 17 : i32
    %9 = tpu.dynamic_rotate %6 by %c17_i32 dim 1 : vector<8x256xf32>, i32 -> vector<8x256xf32>
    %c0_5 = arith.constant 0 : index
    %c0_6 = arith.constant 0 : index
    %10 = vector.load %arg4[%c0_5, %c0_6] : memref<24x256xf32, #tpu.memory_space<vmem>>, vector<1x256xf32>
    %c10 = arith.constant 10 : index
    %c0_7 = arith.constant 0 : index
    %11 = vector.load %arg4[%c10, %c0_7] : memref<24x256xf32, #tpu.memory_space<vmem>>, vector<1x256xf32>
    %12 = vector.broadcast %10 : vector<1x256xf32> to vector<8x256xf32>
    %13 = arith.mulf %9, %12 : vector<8x256xf32>
    %c0_8 = arith.constant 0 : index
    %c0_9 = arith.constant 0 : index
    %14 = vector.load %arg7[%c0_8, %c0_9] : memref<72x256xf32, #tpu.memory_space<vmem>>, vector<8x256xf32>
    tpu.vector_store %arg7[%c0_8, %c0_9], %13 {strides = array<i32>} : memref<72x256xf32, #tpu.memory_space<vmem>>, vector<8x256xf32>,
    %15 = arith.addf %7, %13 : vector<8x256xf32>
    %16 = vector.broadcast %11 : vector<1x256xf32> to vector<8x256xf32>
    %17 = arith.addf %9, %16 : vector<8x256xf32>
    %18 = arith.maximumf %8, %17 : vector<8x256xf32>
    %c16_i32 = arith.constant 16 : i32
    %19 = tpu.dynamic_rotate %6 by %c16_i32 dim 1 : vector<8x256xf32>, i32 -> vector<8x256xf32>
    %c1 = arith.constant 1 : index
    %c0_10 = arith.constant 0 : index
    %20 = vector.load %arg4[%c1, %c0_10] : memref<24x256xf32, #tpu.memory_space<vmem>>, vector<1x256xf32>
    %c11 = arith.constant 11 : index
    %c0_11 = arith.constant 0 : index
    %21 = vector.load %arg4[%c11, %c0_11] : memref<24x256xf32, #tpu.memory_space<vmem>>, vector<1x256xf32>
    %22 = vector.broadcast %20 : vector<1x256xf32> to vector<8x256xf32>
    %23 = arith.mulf %19, %22 : vector<8x256xf32>
    %c8 = arith.constant 8 : index
    %c0_12 = arith.constant 0 : index
    %24 = vector.load %arg7[%c8, %c0_12] : memref<72x256xf32, #tpu.memory_space<vmem>>, vector<8x256xf32>
    tpu.vector_store %arg7[%c8, %c0_12], %23 {strides = array<i32>} : memref<72x256xf32, #tpu.memory_space<vmem>>, vector<8x256xf32>,
    %25 = arith.addf %15, %23 : vector<8x256xf32>
    %26 = vector.broadcast %21 : vector<1x256xf32> to vector<8x256xf32>
    %27 = arith.addf %19, %26 : vector<8x256xf32>
    %28 = arith.maximumf %18, %27 : vector<8x256xf32>
    %c15_i32 = arith.constant 15 : i32
    %29 = tpu.dynamic_rotate %6 by %c15_i32 dim 1 : vector<8x256xf32>, i32 -> vector<8x256xf32>
    %c2 = arith.constant 2 : index
    %c0_13 = arith.constant 0 : index
    %30 = vector.load %arg4[%c2, %c0_13] : memref<24x256xf32, #tpu.memory_space<vmem>>, vector<1x256xf32>
    %c12 = arith.constant 12 : index
    %c0_14 = arith.constant 0 : index
    %31 = vector.load %arg4[%c12, %c0_14] : memref<24x256xf32, #tpu.memory_space<vmem>>, vector<1x256xf32>
    %32 = vector.broadcast %30 : vector<1x256xf32> to vector<8x256xf32>
    %33 = arith.mulf %29, %32 : vector<8x256xf32>
    %c16 = arith.constant 16 : index
    %c0_15 = arith.constant 0 : index
    %34 = vector.load %arg7[%c16, %c0_15] : memref<72x256xf32, #tpu.memory_space<vmem>>, vector<8x256xf32>
    tpu.vector_store %arg7[%c16, %c0_15], %33 {strides = array<i32>} : memref<72x256xf32, #tpu.memory_space<vmem>>, vector<8x256xf32>,
    %35 = arith.addf %25, %33 : vector<8x256xf32>
    %36 = vector.broadcast %31 : vector<1x256xf32> to vector<8x256xf32>
    %37 = arith.addf %29, %36 : vector<8x256xf32>
    %38 = arith.maximumf %28, %37 : vector<8x256xf32>
    %c1_i32 = arith.constant 1 : i32
    %39 = tpu.dynamic_rotate %6 by %c1_i32 dim 1 : vector<8x256xf32>, i32 -> vector<8x256xf32>
    %c3 = arith.constant 3 : index
    %c0_16 = arith.constant 0 : index
    %40 = vector.load %arg4[%c3, %c0_16] : memref<24x256xf32, #tpu.memory_space<vmem>>, vector<1x256xf32>
    %c13 = arith.constant 13 : index
    %c0_17 = arith.constant 0 : index
    %41 = vector.load %arg4[%c13, %c0_17] : memref<24x256xf32, #tpu.memory_space<vmem>>, vector<1x256xf32>
    %42 = vector.broadcast %40 : vector<1x256xf32> to vector<8x256xf32>
    %43 = arith.mulf %39, %42 : vector<8x256xf32>
    %c24 = arith.constant 24 : index
    %c0_18 = arith.constant 0 : index
    %44 = vector.load %arg7[%c24, %c0_18] : memref<72x256xf32, #tpu.memory_space<vmem>>, vector<8x256xf32>
    tpu.vector_store %arg7[%c24, %c0_18], %43 {strides = array<i32>} : memref<72x256xf32, #tpu.memory_space<vmem>>, vector<8x256xf32>,
    %45 = arith.addf %35, %43 : vector<8x256xf32>
    %46 = vector.broadcast %41 : vector<1x256xf32> to vector<8x256xf32>
    %47 = arith.addf %39, %46 : vector<8x256xf32>
    %48 = arith.maximumf %38, %47 : vector<8x256xf32>
    %c4 = arith.constant 4 : index
    %c0_19 = arith.constant 0 : index
    %49 = vector.load %arg4[%c4, %c0_19] : memref<24x256xf32, #tpu.memory_space<vmem>>, vector<1x256xf32>
    %c14 = arith.constant 14 : index
    %c0_20 = arith.constant 0 : index
    %50 = vector.load %arg4[%c14, %c0_20] : memref<24x256xf32, #tpu.memory_space<vmem>>, vector<1x256xf32>
    %51 = vector.broadcast %49 : vector<1x256xf32> to vector<8x256xf32>
    %52 = arith.mulf %6, %51 : vector<8x256xf32>
    %c32 = arith.constant 32 : index
    %c0_21 = arith.constant 0 : index
    %53 = vector.load %arg7[%c32, %c0_21] : memref<72x256xf32, #tpu.memory_space<vmem>>, vector<8x256xf32>
    tpu.vector_store %arg7[%c32, %c0_21], %52 {strides = array<i32>} : memref<72x256xf32, #tpu.memory_space<vmem>>, vector<8x256xf32>,
    %54 = arith.addf %45, %52 : vector<8x256xf32>
    %55 = vector.broadcast %50 : vector<1x256xf32> to vector<8x256xf32>
    %56 = arith.addf %6, %55 : vector<8x256xf32>
    %57 = arith.maximumf %48, %56 : vector<8x256xf32>
    %c255_i32 = arith.constant 255 : i32
    %58 = tpu.dynamic_rotate %6 by %c255_i32 dim 1 : vector<8x256xf32>, i32 -> vector<8x256xf32>
    %c5 = arith.constant 5 : index
    %c0_22 = arith.constant 0 : index
    %59 = vector.load %arg4[%c5, %c0_22] : memref<24x256xf32, #tpu.memory_space<vmem>>, vector<1x256xf32>
    %c15 = arith.constant 15 : index
    %c0_23 = arith.constant 0 : index
    %60 = vector.load %arg4[%c15, %c0_23] : memref<24x256xf32, #tpu.memory_space<vmem>>, vector<1x256xf32>
    %61 = vector.broadcast %59 : vector<1x256xf32> to vector<8x256xf32>
    %62 = arith.mulf %58, %61 : vector<8x256xf32>
    %c40 = arith.constant 40 : index
    %c0_24 = arith.constant 0 : index
    %63 = vector.load %arg7[%c40, %c0_24] : memref<72x256xf32, #tpu.memory_space<vmem>>, vector<8x256xf32>
    tpu.vector_store %arg7[%c40, %c0_24], %62 {strides = array<i32>} : memref<72x256xf32, #tpu.memory_space<vmem>>, vector<8x256xf32>,
    %64 = arith.addf %54, %62 : vector<8x256xf32>
    %65 = vector.broadcast %60 : vector<1x256xf32> to vector<8x256xf32>
    %66 = arith.addf %58, %65 : vector<8x256xf32>
    %67 = arith.maximumf %57, %66 : vector<8x256xf32>
    %c241_i32 = arith.constant 241 : i32
    %68 = tpu.dynamic_rotate %6 by %c241_i32 dim 1 : vector<8x256xf32>, i32 -> vector<8x256xf32>
    %c6 = arith.constant 6 : index
    %c0_25 = arith.constant 0 : index
    %69 = vector.load %arg4[%c6, %c0_25] : memref<24x256xf32, #tpu.memory_space<vmem>>, vector<1x256xf32>
    %c16_26 = arith.constant 16 : index
    %c0_27 = arith.constant 0 : index
    %70 = vector.load %arg4[%c16_26, %c0_27] : memref<24x256xf32, #tpu.memory_space<vmem>>, vector<1x256xf32>
    %71 = vector.broadcast %69 : vector<1x256xf32> to vector<8x256xf32>
    %72 = arith.mulf %68, %71 : vector<8x256xf32>
    %c48 = arith.constant 48 : index
    %c0_28 = arith.constant 0 : index
    %73 = vector.load %arg7[%c48, %c0_28] : memref<72x256xf32, #tpu.memory_space<vmem>>, vector<8x256xf32>
    tpu.vector_store %arg7[%c48, %c0_28], %72 {strides = array<i32>} : memref<72x256xf32, #tpu.memory_space<vmem>>, vector<8x256xf32>,
    %74 = arith.addf %64, %72 : vector<8x256xf32>
    %75 = vector.broadcast %70 : vector<1x256xf32> to vector<8x256xf32>
    %76 = arith.addf %68, %75 : vector<8x256xf32>
    %77 = arith.maximumf %67, %76 : vector<8x256xf32>
    %c240_i32 = arith.constant 240 : i32
    %78 = tpu.dynamic_rotate %6 by %c240_i32 dim 1 : vector<8x256xf32>, i32 -> vector<8x256xf32>
    %c7 = arith.constant 7 : index
    %c0_29 = arith.constant 0 : index
    %79 = vector.load %arg4[%c7, %c0_29] : memref<24x256xf32, #tpu.memory_space<vmem>>, vector<1x256xf32>
    %c17 = arith.constant 17 : index
    %c0_30 = arith.constant 0 : index
    %80 = vector.load %arg4[%c17, %c0_30] : memref<24x256xf32, #tpu.memory_space<vmem>>, vector<1x256xf32>
    %81 = vector.broadcast %79 : vector<1x256xf32> to vector<8x256xf32>
    %82 = arith.mulf %78, %81 : vector<8x256xf32>
    %c56 = arith.constant 56 : index
    %c0_31 = arith.constant 0 : index
    %83 = vector.load %arg7[%c56, %c0_31] : memref<72x256xf32, #tpu.memory_space<vmem>>, vector<8x256xf32>
    tpu.vector_store %arg7[%c56, %c0_31], %82 {strides = array<i32>} : memref<72x256xf32, #tpu.memory_space<vmem>>, vector<8x256xf32>,
    %84 = arith.addf %74, %82 : vector<8x256xf32>
    %85 = vector.broadcast %80 : vector<1x256xf32> to vector<8x256xf32>
    %86 = arith.addf %78, %85 : vector<8x256xf32>
    %87 = arith.maximumf %77, %86 : vector<8x256xf32>
    %c239_i32 = arith.constant 239 : i32
    %88 = tpu.dynamic_rotate %6 by %c239_i32 dim 1 : vector<8x256xf32>, i32 -> vector<8x256xf32>
    %c8_32 = arith.constant 8 : index
    %c0_33 = arith.constant 0 : index
    %89 = vector.load %arg4[%c8_32, %c0_33] : memref<24x256xf32, #tpu.memory_space<vmem>>, vector<1x256xf32>
    %c18 = arith.constant 18 : index
    %c0_34 = arith.constant 0 : index
    %90 = vector.load %arg4[%c18, %c0_34] : memref<24x256xf32, #tpu.memory_space<vmem>>, vector<1x256xf32>
    %91 = vector.broadcast %89 : vector<1x256xf32> to vector<8x256xf32>
    %92 = arith.mulf %88, %91 : vector<8x256xf32>
    %c64 = arith.constant 64 : index
    %c0_35 = arith.constant 0 : index
    %93 = vector.load %arg7[%c64, %c0_35] : memref<72x256xf32, #tpu.memory_space<vmem>>, vector<8x256xf32>
    tpu.vector_store %arg7[%c64, %c0_35], %92 {strides = array<i32>} : memref<72x256xf32, #tpu.memory_space<vmem>>, vector<8x256xf32>,
    %94 = arith.addf %84, %92 : vector<8x256xf32>
    %95 = vector.broadcast %90 : vector<1x256xf32> to vector<8x256xf32>
    %96 = arith.addf %88, %95 : vector<8x256xf32>
    %97 = arith.maximumf %87, %96 : vector<8x256xf32>
    %c9 = arith.constant 9 : index
    %c0_36 = arith.constant 0 : index
    %98 = vector.load %arg4[%c9, %c0_36] : memref<24x256xf32, #tpu.memory_space<vmem>>, vector<1x256xf32>
    %99 = vector.broadcast %98 : vector<1x256xf32> to vector<8x256xf32>
    %100 = arith.mulf %94, %99 : vector<8x256xf32>
    %c0_37 = arith.constant 0 : index
    %c0_38 = arith.constant 0 : index
    %c0_39 = arith.constant 0 : index
    %101 = vector.load %arg5[%c0_37, %c0_38, %c0_39] : memref<1x32x72xf32, #tpu.memory_space<vmem>>, vector<1x32x72xf32>
    %102 = vector.shape_cast %101 : vector<1x32x72xf32> to vector<32x72xf32>
    %c0_40 = arith.constant 0 : index
    %c0_41 = arith.constant 0 : index
    %103 = vector.load %arg7[%c0_40, %c0_41] : memref<72x256xf32, #tpu.memory_space<vmem>>, vector<72x256xf32>
    %cst_42 = arith.constant dense<0.000000e+00> : vector<32x256xf32>
    %104 = tpu.matmul %102, %103, %cst_42 {dimension_numbers = #tpu.dot_dimension_numbers<[1], [0], [0], [1], [0, 0, 1, 1], [], []>} : vector<32x72xf32>, vector<72x256xf32>, vector<32x256xf32> -> vector<32x256xf32>
    %c0_i32_43 = arith.constant 0 : i32
    %105 = arith.cmpi sle, %arg1, %c0_i32_43 : i32
    %106 = arith.extui %105 : i1 to i32
    %c0_i32_44 = arith.constant 0 : i32
    %107 = arith.cmpi ne, %106, %c0_i32_44 : i32
    scf.if %107 {
      %c4_i32 = arith.constant 4 : i32
      %117 = arith.muli %arg1, %c4_i32 : i32
      %c0_i32_49 = arith.constant 0 : i32
      %118 = arith.addi %117, %c0_i32_49 : i32
      %c5_i32 = arith.constant 5 : i32
      %119 = arith.muli %118, %c5_i32 : i32
      %120 = vector.extract_strided_slice %104 {offsets = [0, 0], sizes = [8, 256], strides = [1, 1]} : vector<32x256xf32> to vector<8x256xf32>
      %c1_i32_50 = arith.constant 1 : i32
      %121 = arith.addi %119, %c1_i32_50 : i32
      %122 = arith.index_cast %121 : i32 to index
      %123 = memref.load %arg2[%122] : memref<80xf32, #tpu.memory_space<smem>>
      %124 = vector.broadcast %123 : f32 to vector<8x256xf32>
      %125 = arith.mulf %124, %6 : vector<8x256xf32>
      %c2_i32_51 = arith.constant 2 : i32
      %126 = arith.addi %119, %c2_i32_51 : i32
      %127 = arith.index_cast %126 : i32 to index
      %128 = memref.load %arg2[%127] : memref<80xf32, #tpu.memory_space<smem>>
      %129 = vector.broadcast %128 : f32 to vector<8x256xf32>
      %130 = arith.mulf %129, %120 : vector<8x256xf32>
      %131 = arith.addf %125, %130 : vector<8x256xf32>
      %c3_i32_52 = arith.constant 3 : i32
      %132 = arith.addi %119, %c3_i32_52 : i32
      %133 = arith.index_cast %132 : i32 to index
      %134 = memref.load %arg2[%133] : memref<80xf32, #tpu.memory_space<smem>>
      %135 = vector.broadcast %134 : f32 to vector<8x256xf32>
      %136 = arith.mulf %135, %100 : vector<8x256xf32>
      %137 = arith.addf %131, %136 : vector<8x256xf32>
      %c4_i32_53 = arith.constant 4 : i32
      %138 = arith.addi %119, %c4_i32_53 : i32
      %139 = arith.index_cast %138 : i32 to index
      %140 = memref.load %arg2[%139] : memref<80xf32, #tpu.memory_space<smem>>
      %141 = vector.broadcast %140 : f32 to vector<8x256xf32>
      %142 = arith.mulf %141, %97 : vector<8x256xf32>
      %143 = arith.addf %137, %142 : vector<8x256xf32>
      %c0_i32_54 = arith.constant 0 : i32
      %144 = arith.cmpi eq, %arg1, %c0_i32_54 : i32
      %145 = arith.extui %144 : i1 to i32
      %c0_i32_55 = arith.constant 0 : i32
      %146 = arith.cmpi ne, %145, %c0_i32_55 : i32
      scf.if %146 {
        %c0_58 = arith.constant 0 : index
        %c0_59 = arith.constant 0 : index
        %c0_60 = arith.constant 0 : index
        %150 = vector.load %arg6[%c0_58, %c0_59, %c0_60] : memref<4x8x256xf32, #tpu.memory_space<vmem>>, vector<1x8x256xf32>
        %151 = vector.shape_cast %150 : vector<1x8x256xf32> to vector<8x256xf32>
        %152 = vector.shape_cast %143 : vector<8x256xf32> to vector<1x8x256xf32>
        tpu.vector_store %arg6[%c0_58, %c0_59, %c0_60], %152 {strides = array<i32>} : memref<4x8x256xf32, #tpu.memory_space<vmem>>, vector<1x8x256xf32>,
      } else {
      }
      %c0_i32_56 = arith.constant 0 : i32
      %147 = arith.cmpi ne, %arg1, %c0_i32_56 : i32
      %148 = arith.extui %147 : i1 to i32
      %c0_i32_57 = arith.constant 0 : i32
      %149 = arith.cmpi ne, %148, %c0_i32_57 : i32
      scf.if %149 {
        %c0_58 = arith.constant 0 : index
        %c0_59 = arith.constant 0 : index
        %c0_60 = arith.constant 0 : index
        %150 = vector.load %arg6[%c0_58, %c0_59, %c0_60] : memref<4x8x256xf32, #tpu.memory_space<vmem>>, vector<1x8x256xf32>
        %151 = vector.shape_cast %150 : vector<1x8x256xf32> to vector<8x256xf32>
        %152 = arith.addf %151, %143 : vector<8x256xf32>
        %c0_61 = arith.constant 0 : index
        %c0_62 = arith.constant 0 : index
        %c0_63 = arith.constant 0 : index
        %153 = vector.load %arg6[%c0_61, %c0_62, %c0_63] : memref<4x8x256xf32, #tpu.memory_space<vmem>>, vector<1x8x256xf32>
        %154 = vector.shape_cast %153 : vector<1x8x256xf32> to vector<8x256xf32>
        %155 = vector.shape_cast %152 : vector<8x256xf32> to vector<1x8x256xf32>
        tpu.vector_store %arg6[%c0_61, %c0_62, %c0_63], %155 {strides = array<i32>} : memref<4x8x256xf32, #tpu.memory_space<vmem>>, vector<1x8x256xf32>,
      } else {
      }
    } else {
    }
    %c1_i32_45 = arith.constant 1 : i32
    %108 = arith.cmpi sle, %arg1, %c1_i32_45 : i32
    %109 = arith.extui %108 : i1 to i32
    %c0_i32_46 = arith.constant 0 : i32
    %110 = arith.cmpi ne, %109, %c0_i32_46 : i32
    scf.if %110 {
      %c4_i32 = arith.constant 4 : i32
      %117 = arith.muli %arg1, %c4_i32 : i32
      %c1_i32_49 = arith.constant 1 : i32
      %118 = arith.addi %117, %c1_i32_49 : i32
      %c5_i32 = arith.constant 5 : i32
      %119 = arith.muli %118, %c5_i32 : i32
      %120 = vector.extract_strided_slice %104 {offsets = [8, 0], sizes = [8, 256], strides = [1, 1]} : vector<32x256xf32> to vector<8x256xf32>
      %c1_i32_50 = arith.constant 1 : i32
      %121 = arith.addi %119, %c1_i32_50 : i32
      %122 = arith.index_cast %121 : i32 to index
      %123 = memref.load %arg2[%122] : memref<80xf32, #tpu.memory_space<smem>>
      %124 = vector.broadcast %123 : f32 to vector<8x256xf32>
      %125 = arith.mulf %124, %6 : vector<8x256xf32>
      %c2_i32_51 = arith.constant 2 : i32
      %126 = arith.addi %119, %c2_i32_51 : i32
      %127 = arith.index_cast %126 : i32 to index
      %128 = memref.load %arg2[%127] : memref<80xf32, #tpu.memory_space<smem>>
      %129 = vector.broadcast %128 : f32 to vector<8x256xf32>
      %130 = arith.mulf %129, %120 : vector<8x256xf32>
      %131 = arith.addf %125, %130 : vector<8x256xf32>
      %c3_i32_52 = arith.constant 3 : i32
      %132 = arith.addi %119, %c3_i32_52 : i32
      %133 = arith.index_cast %132 : i32 to index
      %134 = memref.load %arg2[%133] : memref<80xf32, #tpu.memory_space<smem>>
      %135 = vector.broadcast %134 : f32 to vector<8x256xf32>
      %136 = arith.mulf %135, %100 : vector<8x256xf32>
      %137 = arith.addf %131, %136 : vector<8x256xf32>
      %c4_i32_53 = arith.constant 4 : i32
      %138 = arith.addi %119, %c4_i32_53 : i32
      %139 = arith.index_cast %138 : i32 to index
      %140 = memref.load %arg2[%139] : memref<80xf32, #tpu.memory_space<smem>>
      %141 = vector.broadcast %140 : f32 to vector<8x256xf32>
      %142 = arith.mulf %141, %97 : vector<8x256xf32>
      %143 = arith.addf %137, %142 : vector<8x256xf32>
      %c0_i32_54 = arith.constant 0 : i32
      %144 = arith.cmpi eq, %arg1, %c0_i32_54 : i32
      %145 = arith.extui %144 : i1 to i32
      %c0_i32_55 = arith.constant 0 : i32
      %146 = arith.cmpi ne, %145, %c0_i32_55 : i32
      scf.if %146 {
        %c1_58 = arith.constant 1 : index
        %c0_59 = arith.constant 0 : index
        %c0_60 = arith.constant 0 : index
        %150 = vector.load %arg6[%c1_58, %c0_59, %c0_60] : memref<4x8x256xf32, #tpu.memory_space<vmem>>, vector<1x8x256xf32>
        %151 = vector.shape_cast %150 : vector<1x8x256xf32> to vector<8x256xf32>
        %152 = vector.shape_cast %143 : vector<8x256xf32> to vector<1x8x256xf32>
        tpu.vector_store %arg6[%c1_58, %c0_59, %c0_60], %152 {strides = array<i32>} : memref<4x8x256xf32, #tpu.memory_space<vmem>>, vector<1x8x256xf32>,
      } else {
      }
      %c0_i32_56 = arith.constant 0 : i32
      %147 = arith.cmpi ne, %arg1, %c0_i32_56 : i32
      %148 = arith.extui %147 : i1 to i32
      %c0_i32_57 = arith.constant 0 : i32
      %149 = arith.cmpi ne, %148, %c0_i32_57 : i32
      scf.if %149 {
        %c1_58 = arith.constant 1 : index
        %c0_59 = arith.constant 0 : index
        %c0_60 = arith.constant 0 : index
        %150 = vector.load %arg6[%c1_58, %c0_59, %c0_60] : memref<4x8x256xf32, #tpu.memory_space<vmem>>, vector<1x8x256xf32>
        %151 = vector.shape_cast %150 : vector<1x8x256xf32> to vector<8x256xf32>
        %152 = arith.addf %151, %143 : vector<8x256xf32>
        %c1_61 = arith.constant 1 : index
        %c0_62 = arith.constant 0 : index
        %c0_63 = arith.constant 0 : index
        %153 = vector.load %arg6[%c1_61, %c0_62, %c0_63] : memref<4x8x256xf32, #tpu.memory_space<vmem>>, vector<1x8x256xf32>
        %154 = vector.shape_cast %153 : vector<1x8x256xf32> to vector<8x256xf32>
        %155 = vector.shape_cast %152 : vector<8x256xf32> to vector<1x8x256xf32>
        tpu.vector_store %arg6[%c1_61, %c0_62, %c0_63], %155 {strides = array<i32>} : memref<4x8x256xf32, #tpu.memory_space<vmem>>, vector<1x8x256xf32>,
      } else {
      }
    } else {
    }
    %c2_i32 = arith.constant 2 : i32
    %111 = arith.cmpi sle, %arg1, %c2_i32 : i32
    %112 = arith.extui %111 : i1 to i32
    %c0_i32_47 = arith.constant 0 : i32
    %113 = arith.cmpi ne, %112, %c0_i32_47 : i32
    scf.if %113 {
      %c4_i32 = arith.constant 4 : i32
      %117 = arith.muli %arg1, %c4_i32 : i32
      %c2_i32_49 = arith.constant 2 : i32
      %118 = arith.addi %117, %c2_i32_49 : i32
      %c5_i32 = arith.constant 5 : i32
      %119 = arith.muli %118, %c5_i32 : i32
      %120 = vector.extract_strided_slice %104 {offsets = [16, 0], sizes = [8, 256], strides = [1, 1]} : vector<32x256xf32> to vector<8x256xf32>
      %c1_i32_50 = arith.constant 1 : i32
      %121 = arith.addi %119, %c1_i32_50 : i32
      %122 = arith.index_cast %121 : i32 to index
      %123 = memref.load %arg2[%122] : memref<80xf32, #tpu.memory_space<smem>>
      %124 = vector.broadcast %123 : f32 to vector<8x256xf32>
      %125 = arith.mulf %124, %6 : vector<8x256xf32>
      %c2_i32_51 = arith.constant 2 : i32
      %126 = arith.addi %119, %c2_i32_51 : i32
      %127 = arith.index_cast %126 : i32 to index
      %128 = memref.load %arg2[%127] : memref<80xf32, #tpu.memory_space<smem>>
      %129 = vector.broadcast %128 : f32 to vector<8x256xf32>
      %130 = arith.mulf %129, %120 : vector<8x256xf32>
      %131 = arith.addf %125, %130 : vector<8x256xf32>
      %c3_i32_52 = arith.constant 3 : i32
      %132 = arith.addi %119, %c3_i32_52 : i32
      %133 = arith.index_cast %132 : i32 to index
      %134 = memref.load %arg2[%133] : memref<80xf32, #tpu.memory_space<smem>>
      %135 = vector.broadcast %134 : f32 to vector<8x256xf32>
      %136 = arith.mulf %135, %100 : vector<8x256xf32>
      %137 = arith.addf %131, %136 : vector<8x256xf32>
      %c4_i32_53 = arith.constant 4 : i32
      %138 = arith.addi %119, %c4_i32_53 : i32
      %139 = arith.index_cast %138 : i32 to index
      %140 = memref.load %arg2[%139] : memref<80xf32, #tpu.memory_space<smem>>
      %141 = vector.broadcast %140 : f32 to vector<8x256xf32>
      %142 = arith.mulf %141, %97 : vector<8x256xf32>
      %143 = arith.addf %137, %142 : vector<8x256xf32>
      %c0_i32_54 = arith.constant 0 : i32
      %144 = arith.cmpi eq, %arg1, %c0_i32_54 : i32
      %145 = arith.extui %144 : i1 to i32
      %c0_i32_55 = arith.constant 0 : i32
      %146 = arith.cmpi ne, %145, %c0_i32_55 : i32
      scf.if %146 {
        %c2_58 = arith.constant 2 : index
        %c0_59 = arith.constant 0 : index
        %c0_60 = arith.constant 0 : index
        %150 = vector.load %arg6[%c2_58, %c0_59, %c0_60] : memref<4x8x256xf32, #tpu.memory_space<vmem>>, vector<1x8x256xf32>
        %151 = vector.shape_cast %150 : vector<1x8x256xf32> to vector<8x256xf32>
        %152 = vector.shape_cast %143 : vector<8x256xf32> to vector<1x8x256xf32>
        tpu.vector_store %arg6[%c2_58, %c0_59, %c0_60], %152 {strides = array<i32>} : memref<4x8x256xf32, #tpu.memory_space<vmem>>, vector<1x8x256xf32>,
      } else {
      }
      %c0_i32_56 = arith.constant 0 : i32
      %147 = arith.cmpi ne, %arg1, %c0_i32_56 : i32
      %148 = arith.extui %147 : i1 to i32
      %c0_i32_57 = arith.constant 0 : i32
      %149 = arith.cmpi ne, %148, %c0_i32_57 : i32
      scf.if %149 {
        %c2_58 = arith.constant 2 : index
        %c0_59 = arith.constant 0 : index
        %c0_60 = arith.constant 0 : index
        %150 = vector.load %arg6[%c2_58, %c0_59, %c0_60] : memref<4x8x256xf32, #tpu.memory_space<vmem>>, vector<1x8x256xf32>
        %151 = vector.shape_cast %150 : vector<1x8x256xf32> to vector<8x256xf32>
        %152 = arith.addf %151, %143 : vector<8x256xf32>
        %c2_61 = arith.constant 2 : index
        %c0_62 = arith.constant 0 : index
        %c0_63 = arith.constant 0 : index
        %153 = vector.load %arg6[%c2_61, %c0_62, %c0_63] : memref<4x8x256xf32, #tpu.memory_space<vmem>>, vector<1x8x256xf32>
        %154 = vector.shape_cast %153 : vector<1x8x256xf32> to vector<8x256xf32>
        %155 = vector.shape_cast %152 : vector<8x256xf32> to vector<1x8x256xf32>
        tpu.vector_store %arg6[%c2_61, %c0_62, %c0_63], %155 {strides = array<i32>} : memref<4x8x256xf32, #tpu.memory_space<vmem>>, vector<1x8x256xf32>,
      } else {
      }
    } else {
    }
    %c3_i32 = arith.constant 3 : i32
    %114 = arith.cmpi sle, %arg1, %c3_i32 : i32
    %115 = arith.extui %114 : i1 to i32
    %c0_i32_48 = arith.constant 0 : i32
    %116 = arith.cmpi ne, %115, %c0_i32_48 : i32
    scf.if %116 {
      %c4_i32 = arith.constant 4 : i32
      %117 = arith.muli %arg1, %c4_i32 : i32
      %c3_i32_49 = arith.constant 3 : i32
      %118 = arith.addi %117, %c3_i32_49 : i32
      %c5_i32 = arith.constant 5 : i32
      %119 = arith.muli %118, %c5_i32 : i32
      %120 = vector.extract_strided_slice %104 {offsets = [24, 0], sizes = [8, 256], strides = [1, 1]} : vector<32x256xf32> to vector<8x256xf32>
      %c1_i32_50 = arith.constant 1 : i32
      %121 = arith.addi %119, %c1_i32_50 : i32
      %122 = arith.index_cast %121 : i32 to index
      %123 = memref.load %arg2[%122] : memref<80xf32, #tpu.memory_space<smem>>
      %124 = vector.broadcast %123 : f32 to vector<8x256xf32>
      %125 = arith.mulf %124, %6 : vector<8x256xf32>
      %c2_i32_51 = arith.constant 2 : i32
      %126 = arith.addi %119, %c2_i32_51 : i32
      %127 = arith.index_cast %126 : i32 to index
      %128 = memref.load %arg2[%127] : memref<80xf32, #tpu.memory_space<smem>>
      %129 = vector.broadcast %128 : f32 to vector<8x256xf32>
      %130 = arith.mulf %129, %120 : vector<8x256xf32>
      %131 = arith.addf %125, %130 : vector<8x256xf32>
      %c3_i32_52 = arith.constant 3 : i32
      %132 = arith.addi %119, %c3_i32_52 : i32
      %133 = arith.index_cast %132 : i32 to index
      %134 = memref.load %arg2[%133] : memref<80xf32, #tpu.memory_space<smem>>
      %135 = vector.broadcast %134 : f32 to vector<8x256xf32>
      %136 = arith.mulf %135, %100 : vector<8x256xf32>
      %137 = arith.addf %131, %136 : vector<8x256xf32>
      %c4_i32_53 = arith.constant 4 : i32
      %138 = arith.addi %119, %c4_i32_53 : i32
      %139 = arith.index_cast %138 : i32 to index
      %140 = memref.load %arg2[%139] : memref<80xf32, #tpu.memory_space<smem>>
      %141 = vector.broadcast %140 : f32 to vector<8x256xf32>
      %142 = arith.mulf %141, %97 : vector<8x256xf32>
      %143 = arith.addf %137, %142 : vector<8x256xf32>
      %c0_i32_54 = arith.constant 0 : i32
      %144 = arith.cmpi eq, %arg1, %c0_i32_54 : i32
      %145 = arith.extui %144 : i1 to i32
      %c0_i32_55 = arith.constant 0 : i32
      %146 = arith.cmpi ne, %145, %c0_i32_55 : i32
      scf.if %146 {
        %c3_58 = arith.constant 3 : index
        %c0_59 = arith.constant 0 : index
        %c0_60 = arith.constant 0 : index
        %150 = vector.load %arg6[%c3_58, %c0_59, %c0_60] : memref<4x8x256xf32, #tpu.memory_space<vmem>>, vector<1x8x256xf32>
        %151 = vector.shape_cast %150 : vector<1x8x256xf32> to vector<8x256xf32>
        %152 = vector.shape_cast %143 : vector<8x256xf32> to vector<1x8x256xf32>
        tpu.vector_store %arg6[%c3_58, %c0_59, %c0_60], %152 {strides = array<i32>} : memref<4x8x256xf32, #tpu.memory_space<vmem>>, vector<1x8x256xf32>,
      } else {
      }
      %c0_i32_56 = arith.constant 0 : i32
      %147 = arith.cmpi ne, %arg1, %c0_i32_56 : i32
      %148 = arith.extui %147 : i1 to i32
      %c0_i32_57 = arith.constant 0 : i32
      %149 = arith.cmpi ne, %148, %c0_i32_57 : i32
      scf.if %149 {
        %c3_58 = arith.constant 3 : index
        %c0_59 = arith.constant 0 : index
        %c0_60 = arith.constant 0 : index
        %150 = vector.load %arg6[%c3_58, %c0_59, %c0_60] : memref<4x8x256xf32, #tpu.memory_space<vmem>>, vector<1x8x256xf32>
        %151 = vector.shape_cast %150 : vector<1x8x256xf32> to vector<8x256xf32>
        %152 = arith.addf %151, %143 : vector<8x256xf32>
        %c3_61 = arith.constant 3 : index
        %c0_62 = arith.constant 0 : index
        %c0_63 = arith.constant 0 : index
        %153 = vector.load %arg6[%c3_61, %c0_62, %c0_63] : memref<4x8x256xf32, #tpu.memory_space<vmem>>, vector<1x8x256xf32>
        %154 = vector.shape_cast %153 : vector<1x8x256xf32> to vector<8x256xf32>
        %155 = vector.shape_cast %152 : vector<8x256xf32> to vector<1x8x256xf32>
        tpu.vector_store %arg6[%c3_61, %c0_62, %c0_63], %155 {strides = array<i32>} : memref<4x8x256xf32, #tpu.memory_space<vmem>>, vector<1x8x256xf32>,
      } else {
      }
    } else {
    }
    return
  }
  func.func @transform_0(%arg0: i32, %arg1: i32, %arg2: memref<80xf32, #tpu.memory_space<smem>>) -> (i32, i32) {
    %c0_i32 = arith.constant 0 : i32
    %c0_i32_0 = arith.constant 0 : i32
    return %c0_i32, %arg0 : i32, i32
  }
  func.func @transform_1(%arg0: i32, %arg1: i32, %arg2: memref<80xf32, #tpu.memory_space<smem>>) -> (i32, i32) {
    %c0_i32 = arith.constant 0 : i32
    %c0_i32_0 = arith.constant 0 : i32
    %c0_i32_1 = arith.constant 0 : i32
    return %c0_i32, %c0_i32_0 : i32, i32
  }
  func.func @transform_2(%arg0: i32, %arg1: i32, %arg2: memref<80xf32, #tpu.memory_space<smem>>) -> (i32, i32, i32) {
    %c0_i32 = arith.constant 0 : i32
    %c0_i32_0 = arith.constant 0 : i32
    %c0_i32_1 = arith.constant 0 : i32
    return %arg1, %c0_i32, %c0_i32_0 : i32, i32, i32
  }
  func.func @transform_3(%arg0: i32, %arg1: i32, %arg2: memref<80xf32, #tpu.memory_space<smem>>) -> (i32, i32, i32) {
    %c0_i32 = arith.constant 0 : i32
    %c0_i32_0 = arith.constant 0 : i32
    %c0_i32_1 = arith.constant 0 : i32
    return %c0_i32, %c0_i32_0, %arg0 : i32, i32, i32
  }
}

</mosaic_0001>

<bundles_post_ra>
// kernel: search_cnn_forward.1
= control target key start
LH: loop header
LB: loop body
LE: loop exit
PB: predicated region body
PF: predicated region fallthrough
CT: control target
= control target key end

     0   :  { %s1808_s0 = inlined_call_operand.vmem [shape: f32[80], index: 0, kind: input, shape index: {}]   ;;  %s1809_s1 = inlined_call_operand.vmem [shape: f32[8,512], index: 1, kind: input, shape index: {}]   ;;  %s1810_s2 = inlined_call_operand.vmem [shape: f32[24,256], index: 2, kind: input, shape index: {}]   ;;  %s1811_s3 = inlined_call_operand.vmem [shape: f32[4,32,72], index: 3, kind: input, shape index: {}]   ;;  %s1812_s4 = inlined_call_operand.vmem [shape: f32[4,8,512], index: 4, kind: output, shape index: {}]  }
   0x1   :  { %s9_s17 = sshll.u32 %s1808_s0, 4  ;;  %s10_s17 = int_to_ptr.vmem [resolvable:$true] %s9_s17 }
   0x2   :  { %s1222_s18 = scalar_lea.vmem %s10_s17, 16  ;;  %p1227_p1 = scmp.lt.s32.totalorder %s10_s17, %s10_s17 }
   0x3   :  { %p1223_p0 = scmp.ne.s32.totalorder %s10_s17, %s1222_s18  ;;  %p1228_p2 = scmp.lt.s32.totalorder %s1222_s18, %s1222_s18 }
   0x5   :  { %p1229_p3 = por %p1228_p2, %p1227_p1 }
   0x7   :  { %p1230_p4 = pnand %p1229_p3, %p1223_p0 }
   0x9   :  { %1233 = shalt.err (!%p1230_p4)  }
   0xa   :  { %s1292_s19 = smov [#allocation5]  }
   0xb   :  { %12 = dma.vmem_to_smem %s10_s17, 16, %s1292_s19, [#allocation4] }
   0xc   :  { %1262 = dma.done.wait [#allocation4], 16 }
   0xd   :  { %1263 = vsyncadd [#allocation4], 4294967280 }
   0xe   :  { %14 = sfence }
   0xf   :  { %s1330_s20 = smov 0   ;;  %s1332_s21 = smov 0  }
  0x10   :  { %s1334_s22 = smov 0   ;;  %s1336_s0 = smov 0  }
  0x11   :  { %s1338_s23 = smov 0   ;;  %s1340_s24 = smov 0  }
  0x12   :  { %s1342_s25 = smov 0  }
  0x13 LB: > { %s29_s26 = sadd.s32 1, %s1282_s23  ;;  %s32_s27 = sadd.s32 1, %s1286_s24  ;;  %s1290_s25 = sphi %s1342_s25, %s20_s25   ;;  %s1286_s24 = sphi %s1340_s24, %s1819_s24   ;;  %s1282_s23 = sphi %s1338_s23, %s1818_s23   ;;  %s1278_s0 = sphi %s1336_s0, %s1817_s0   ;;  %s1274_s22 = sphi %s1334_s22, %s1816_s22   ;;  %s1270_s21 = sphi %s1332_s21, %s1815_s21   ;;  %s1266_s20 = sphi %s1330_s20, %s1814_s20  }
  0x14   : > { %p30_p5 = scmp.ge.s32.totalorder %s29_s26, 4  ;;  %s1060_s28 = sadd.s32 4294967295, %s1290_s25  }
  0x15   : > { %p122_p6 = scmp.ne.s32.totalorder %s1270_s21, %s1266_s20  ;;  %p123_p7 = scmp.eq.s32.totalorder %s1060_s28, 7 }
  0x16   : > { %s1821_s26 = smov (%p30_p5, %s29_s26), 0  ;;  %s1823_s27 = smov (!%p30_p5, %s32_s27), %s1286_s24 }
  0x17   : > { %p1064_p8 = scmp.ge.s32.totalorder %s1290_s25, 1  ;;  %p34_p9 = scmp.ge.s32.totalorder %s1823_s27, 2 }
  0x18   : > { %p167_p10 = scmp.lt.s32.totalorder %s1290_s25, 9  ;;  %p1372_p11 = por %p123_p7, %p122_p6 }
  0x19   : > { %s1825_s27 = smov (%p34_p9, %s1823_s27), 0  ;;  %s112_s5 = sadd.s32 1, %s1270_s21 }
  0x1a   : > { %p168_p12 = pnand %p1064_p8, %p167_p10  ;;  %s109_s30 = ssub.s32 %s1286_s24, %s1825_s27 }
  0x1b   : > { %p110_p13 = scmp.eq.s32.totalorder %s109_s30, 0  ;;  %s192_s7 = sand.u32 (!%p168_p12), 1, %s1266_s20  }
  0x1c   : > { %171 = sbr.rel (%p168_p12) target bundleno = 536 (0x218), region = 32  ;;  %s1066_s8 = sshll.u32 (!%p168_p12), %s1278_s0, 1 }
  0x1d   : > { %s1382_s6 = scalar_select %p110_p13, %s1270_s21, %s112_s5  }
  0x1e   : > { %s1065_s9 = sshll.u32 (!%p168_p12), %s192_s7, 6  ;;  %p196_p0 = scmp.lt.s32.totalorder (!%p168_p12), %s1066_s8, 3 }
  0x1f   : > { %p201_p1 = scmp.lt.s32.totalorder (!%p168_p12), %s1274_s22, 3  ;;  %s1395_s19 = scalar_lea.vmem (!%p168_p12), [#allocation6], %s1065_s9 }
  0x20   : > { %p1070_p2 = scmp.ne.s32.totalorder (!%p168_p12), %s1274_s22, 0 }
  0x21   : > { %s1827_s8 = smov (!%p196_p0, %s1066_s8), 3 }
  0x22   : > { %s202_s10 = scalar_select %p201_p1, %s1274_s22, 3 }
  0x23   : > { %s1067_s11 = sshll.u32 %s1827_s8, 3  ;;  %210 = sbr.rel (%p1070_p2) target bundleno = 42 (0x2a), region = 36 }
  0x24   : > { %s199_s14 = scalar_lea.vmem %s1809_s1, %s1067_s11  ;;  %s1135_s15 = sshll.u32 %s202_s10, 5 }
  0x25   : > { %s1393_s18 = scalar_lea.vmem %s1811_s3, %s1135_s15 }
  0x28   : > { %v211_v0 = vld [vmem:[%s199_s14] sm:$0xff]  ;;  %v212_v1 = vld [vmem:[%s199_s14 + $0x8] sm:$0xff] }
  0x29   : > { %213 = vst [vmem:[#allocation3] sm:$0xff] %v211_v0  ;;  %214 = vst [vmem:[#allocation3 + $0x8] sm:$0xff] %v212_v1 }
  0x2a PF: > { %p1071_p3 = scmp.eq.s32.totalorder %s1274_s22, 0 }
  0x2b   : > { %s1072_s20 = sadd.s32 (!%p1071_p3), 4294967295, %s1274_s22 }
  0x2c   : > { %218 = sbr.rel (%p1071_p3) target bundleno = 54 (0x36), region = 40  ;;  %p220_p4 = scmp.gt.s32.totalorder (!%p1071_p3), %s1072_s20, 0 }
  0x31   : > { %s1829_s20 = smov (!%p220_p4, %s1072_s20), 0 }
  0x32   : > { %s1136_s28 = sshll.u32 %s1829_s20, 4 }
  0x33   : > { %s224_s30 = scalar_lea.vmem %s1395_s19, %s1136_s28 [#allocation6] }
  0x34   : > { %v225_v2 = vld [vmem:[%s224_s30] sm:$0xff]  ;;  %v226_v3 = vld [vmem:[%s224_s30 + $0x8] sm:$0xff] }
  0x35   : > { %227 = vst [vmem:[#allocation3] sm:$0xff] %v225_v2  ;;  %228 = vst [vmem:[#allocation3 + $0x8] sm:$0xff] %v226_v3 }
  0x36 PF: > { %s1293_s5 = smov 112   ;;  %s1294_s7 = smov 111   ;;  %v235_v6 = vlaneseq  ;;  %v1083_v9 = vld [vmem:[%s1810_s2 + $0x16] ss:$8 sm:$0x3]  ;;  %v1299_v14 = vmov 0.0  }
  0x37   : > { %s1295_s8 = smov 113   ;;  %s1296_s9 = smov 127   ;;  %726 = vmatprep.mubr.f32.mxu0 %v1299_v14  ;;  %738 = vmatprep.mubr.f32.mxu1 %v1299_v14  ;;  %v1088_v17 = vld [vmem:[%s1810_s2 + $0x7] ss:$8 sm:$0x3]  ;;  %vm649_vm8 = vcmask 588800  }
  0x38   : > { %v245_v7 = vshrl.u32 %v235_v6, 7  ;;  %s1297_s12 = smov 1   ;;  %s1298_s13 = smov 15   ;;  %v1442_v16 = vand.u32 127, %v235_v6 }
  0x39   : > { %s1300_s14 = smov 16   ;;  %s1301_s15 = smov 17   ;;  %v1089_v18 = vld [vmem:[%s1810_s2 + $0x21] ss:$8 sm:$0x3] }
  0x3a   : > { %v1417_v8 = vsub.s32 1, %v245_v7  ;;  %v1425_v11 = vsub.s32 0, %v245_v7  ;;  %vm530_vm0 = vcmp.lt.s32.totalorder %v1442_v16, 112  ;;  %vm573_vm1 = vcmp.lt.s32.totalorder %v1442_v16, 111  ;;  %p1097_p5 = scmp.gt.s32.totalorder %s1274_s22, 0 }
  0x3b   : > { %v1090_v21 = vld [vmem:[%s1810_s2 + $0x10] ss:$8 sm:$0x3]  ;;  %v1091_v22 = vld [vmem:[%s1810_s2 + $0x22] ss:$8 sm:$0x3] }
  0x3c   : > { %v1405_v4 = vld [vmem:[#allocation3] sm:$0xff]  ;;  %v1409_v5 = vld [vmem:[#allocation3 + $0x8] sm:$0xff]  ;;  %v433_v10 = vrot.slane %v1083_v9, %v1417_v8  ;;  %v429_v13 = vrot.slane %v1083_v9, %v1425_v11  ;;  %v541_v25 = vrot.slane %v1088_v17, %v1425_v11  ;;  %v545_v26 = vrot.slane %v1088_v17, %v1417_v8  ;;  %v1085_v43 = vld [vmem:[%s1810_s2 + $0x17] ss:$8 sm:$0x3] }
  0x3d   : > { %526 = vrot.lane.b32.xlu1 %v1405_v4, %s1293_s5  ;;  %569 = vrot.lane.b32.xlu0 %v1405_v4, %s1294_s7  ;;  %v1086_v23 = vld [vmem:[%s1810_s2 + $0x6] ss:$8 sm:$0x3]  ;;  %v1087_v24 = vld [vmem:[%s1810_s2 + $0x20] ss:$8 sm:$0x3]  ;;  %v558_v27 = vrot.slane %v1089_v18, %v1425_v11  ;;  %v562_v28 = vrot.slane %v1089_v18, %v1417_v8  ;;  %v584_v29 = vrot.slane %v1090_v21, %v1425_v11 }
  0x3e   : > { %v1428_v12 = vadd.f32 %v433_v10, %v1409_v5  ;;  %v1438_v15 = vadd.f32 %v429_v13, %v1405_v4  ;;  %v588_v30 = vrot.slane %v1090_v21, %v1417_v8  ;;  %v601_v31 = vrot.slane %v1091_v22, %v1425_v11  ;;  %v1475_v33 = vld [vmem:[%s1810_s2 + $0x5] ss:$8 sm:$0x3]  ;;  %v1082_v44 = vld [vmem:[%s1810_s2 + $0x4] ss:$8 sm:$0x3] }
  0x3f   : > { %v605_v32 = vrot.slane %v1091_v22, %v1417_v8  ;;  %vm487_vm2 = vcmp.lt.s32.totalorder %v1442_v16, 113  ;;  %v498_v36 = vrot.slane %v1086_v23, %v1425_v11  ;;  %v502_v37 = vrot.slane %v1086_v23, %v1417_v8  ;;  %v1080_v58 = vld [vmem:[%s1810_s2 + $0x3] ss:$8 sm:$0x3] }
  0x40   : > { %v515_v38 = vrot.slane %v1087_v24, %v1425_v11  ;;  %v519_v47 = vrot.slane %v1087_v24, %v1417_v8  ;;  %v455_v48 = vrot.slane %v1475_v33, %v1425_v11  ;;  %v459_v55 = vrot.slane %v1475_v33, %v1417_v8  ;;  %v1081_v63 = vld [vmem:[%s1810_s2 + $0x15] ss:$8 sm:$0x3]  ;;  %v1078_v23 = vld [vmem:[%s1810_s2 + $0x2] ss:$8 sm:$0x3] }
  0x41   : > { %528 = vrot.lane.b32.xlu1 %v1409_v5, %s1293_s5  ;;  %571 = vrot.lane.b32.xlu0 %v1409_v5, %s1294_s7  ;;  %v472_v56 = vrot.slane %v1085_v43, %v1425_v11  ;;  %v476_v57 = vrot.slane %v1085_v43, %v1417_v8  ;;  %v416_v59 = vrot.slane %v1082_v44, %v1417_v8  ;;  %vm444_vm3 = vcmp.lt.s32.totalorder %v1442_v16, 127  ;;  %v1079_v24 = vld [vmem:[%s1810_s2 + $0x14] ss:$8 sm:$0x3] }
  0x42   : > { %v376_v7 = vrot.slane %v1080_v58, %v1425_v11  ;;  %v412_v9 = vrot.slane %v1082_v44, %v1425_v11  ;;  %vm365_vm4 = vcmp.lt.s32.totalorder %v1442_v16, 1  ;;  %v380_v17 = vrot.slane %v1080_v58, %v1417_v8  ;;  %v240_v58 = vld [vmem:[%s1810_s2] ss:$8 sm:$0x3] }
  0x43   : > { %v393_v18 = vrot.slane %v1081_v63, %v1425_v11  ;;  %v1558_v22 = vmul.f32 %v416_v59, %v1409_v5  ;;  %vm322_vm5 = vcmp.lt.s32.totalorder %v1442_v16, 15  ;;  %v337_v33 = vrot.slane %v1078_v23, %v1417_v8  ;;  %v1075_v59 = vld [vmem:[%s1810_s2 + $0x12] ss:$8 sm:$0x3] }
  0x44   : > { %vm279_vm6 = vcmp.lt.s32.totalorder %v1442_v16, 16  ;;  %vm237_vm7 = vcmp.lt.s32.totalorder %v1442_v16, 17 }
  0x45   : > { %485 = vrot.lane.b32.xlu1 %v1409_v5, %s1295_s8  ;;  %483 = vrot.lane.b32.xlu0 %v1405_v4, %s1295_s8 }
  0x49   : > { %442 = vrot.lane.b32.xlu1 %v1409_v5, %s1296_s9  ;;  %440 = vrot.lane.b32.xlu0 %v1405_v4, %s1296_s9 }
  0x4d   : > { %363 = vrot.lane.b32.xlu1 %v1409_v5, %s1297_s12  ;;  %361 = vrot.lane.b32.xlu0 %v1405_v4, %s1297_s12 }
  0x51   : > { %320 = vrot.lane.b32.xlu1 %v1409_v5, %s1298_s13  ;;  %318 = vrot.lane.b32.xlu0 %v1405_v4, %s1298_s13 }
  0x55   : > { %277 = vrot.lane.b32.xlu1 %v1409_v5, %s1300_s14  ;;  %275 = vrot.lane.b32.xlu0 %v1405_v4, %s1300_s14 }
  0x59   : > { %233 = vrot.lane.b32.xlu1 %v1409_v5, %s1301_s15  ;;  %231 = vrot.lane.b32.xlu0 %v1405_v4, %s1301_s15 }
  0xaf   : > { %v527_v19 = vpop.permute.xlu1 %526  ;;  %v570_v20 = vpop.permute.xlu0 %569 }
  0xb3   : > { %v529_v34 = vpop.permute.xlu1 %528  ;;  %v572_v35 = vpop.permute.xlu0 %571 }
  0xb4   : > { %v531_v39 = vsel %vm530_vm0, %v527_v19, %v529_v34  ;;  %v532_v40 = vsel %vm530_vm0, %v529_v34, %v527_v19  ;;  %v574_v41 = vsel %vm573_vm1, %v570_v20, %v572_v35  ;;  %v575_v42 = vsel %vm573_vm1, %v572_v35, %v570_v20 }
  0xb5   : > { %v1495_v45 = vadd.f32 %v558_v27, %v531_v39  ;;  %v1497_v46 = vadd.f32 %v562_v28, %v532_v40  ;;  %v1502_v49 = vmul.f32 %v584_v29, %v574_v41  ;;  %v1504_v50 = vmul.f32 %v588_v30, %v575_v42 }
  0xb6   : > { %v1506_v51 = vadd.f32 %v601_v31, %v574_v41  ;;  %v1508_v52 = vadd.f32 %v605_v32, %v575_v42  ;;  %v1518_v60 = vmul.f32 %v545_v26, %v532_v40  ;;  %v1530_v0 = vmul.f32 %v541_v25, %v531_v39  ;;  %v1077_v39 = vld [vmem:[%s1810_s2 + $0x13] ss:$8 sm:$0x3] }
  0xb7   : > { %v486_v53 = vpop.permute.xlu1 %485  ;;  %v484_v54 = vpop.permute.xlu0 %483  ;;  %676 = vmatprep.subr.mxu0 %v1504_v50  ;;  %1138 = vmatprep.subr.mxu1 %v1504_v50  ;;  %v397_v19 = vrot.slane %v1081_v63, %v1417_v8  ;;  %v1578_v29 = vmul.f32 %v412_v9, %v1405_v4  ;;  %v333_v32 = vrot.slane %v1078_v23, %v1425_v11 }
  0xb8   : > { %v488_v61 = vsel %vm487_vm2, %v484_v54, %v486_v53  ;;  %v489_v62 = vsel %vm487_vm2, %v486_v53, %v484_v54  ;;  %677 = vmatpush1.msra.mxu0 %v1502_v49  ;;  %1147 = vmatpush1.msra.mxu1 %v1502_v49  ;;  %v350_v34 = vrot.slane %v1079_v24, %v1425_v11 }
  0xb9   : > { %v1532_v1 = vmul.f32 %v502_v37, %v489_v62  ;;  %v1534_v2 = vadd.f32 %v515_v38, %v488_v61  ;;  %v1536_v3 = vadd.f32 %v519_v47, %v489_v62  ;;  %v1539_v6 = vmul.f32 %v498_v36, %v488_v61  ;;  %678 = vmatprep.subr.mxu0 %v1518_v60  ;;  %v1076_v38 = vld [vmem:[%s1810_s2 + $0x1] ss:$8 sm:$0x3] }
  0xba   : > { %1139 = vmatprep.subr.mxu1 %v1518_v60  ;;  %679 = vmatpush1.msra.mxu0 %v1530_v0  ;;  %v354_v37 = vrot.slane %v1079_v24, %v1417_v8  ;;  %v294_v53 = vrot.slane %v1076_v38, %v1417_v8  ;;  %v307_v54 = vrot.slane %v1077_v39, %v1425_v11 }
  0xbb   : > { %v443_v10 = vpop.permute.xlu1 %442  ;;  %v441_v13 = vpop.permute.xlu0 %440  ;;  %1148 = vmatpush1.msra.mxu1 %v1530_v0  ;;  %680 = vmatprep.subr.mxu0 %v1532_v1 }
  0xbc   : > { %v445_v20 = vsel %vm444_vm3, %v441_v13, %v443_v10  ;;  %v446_v21 = vsel %vm444_vm3, %v443_v10, %v441_v13  ;;  %1140 = vmatprep.subr.mxu1 %v1532_v1  ;;  %681 = vmatpush1.msra.mxu0 %v1539_v6  ;;  %v247_v13 = vrot.slane %v240_v58, %v1425_v11 }
  0xbd   : > { %v1567_v25 = vmul.f32 %v455_v48, %v445_v20  ;;  %v1569_v26 = vmul.f32 %v459_v55, %v446_v21  ;;  %v1571_v27 = vadd.f32 %v472_v56, %v445_v20  ;;  %v1573_v28 = vadd.f32 %v476_v57, %v446_v21  ;;  %1149 = vmatpush1.msra.mxu1 %v1539_v6 }
  0xbe   : > { %v290_v48 = vrot.slane %v1076_v38, %v1425_v11  ;;  %v311_v57 = vrot.slane %v1077_v39, %v1417_v8  ;;  %v268_v21 = vrot.slane %v1075_v59, %v1417_v8  ;;  %v627_v39 = vld [vmem:[%s1393_s18] sm:$0xff] }
  0xbf   : > { %v364_v30 = vpop.permute.xlu1 %363  ;;  %682 = vmatprep.subr.mxu0 %v1569_v26  ;;  %1141 = vmatprep.subr.mxu1 %v1569_v26  ;;  %v362_v31 = vpop.permute.xlu0 %361 }
  0xc0   : > { %v366_v35 = vsel %vm365_vm4, %v362_v31, %v364_v30  ;;  %v367_v36 = vsel %vm365_vm4, %v364_v30, %v362_v31  ;;  %683 = vmatpush1.msra.mxu0 %v1567_v25  ;;  %1150 = vmatpush1.msra.mxu1 %v1567_v25 }
  0xc1   : > { %v1599_v40 = vmul.f32 %v376_v7, %v367_v36  ;;  %v1601_v41 = vmul.f32 %v380_v17, %v366_v35  ;;  %v1603_v42 = vadd.f32 %v393_v18, %v367_v36  ;;  %v1605_v43 = vadd.f32 %v397_v19, %v366_v35  ;;  %684 = vmatprep.subr.mxu0 %v1558_v22 }
  0xc2   : > { %1142 = vmatprep.subr.mxu1 %v1558_v22  ;;  %685 = vmatpush1.msra.mxu0 %v1578_v29  ;;  %v251_v17 = vrot.slane %v240_v58, %v1417_v8  ;;  %v264_v18 = vrot.slane %v1075_v59, %v1425_v11  ;;  %v628_v59 = vld [vmem:[%s1393_s18 + $0x8] sm:$0xff] }
  0xc3   : > { %1151 = vmatpush1.msra.mxu1 %v1578_v29  ;;  %v321_v44 = vpop.permute.xlu1 %320  ;;  %v319_v47 = vpop.permute.xlu0 %318  ;;  %686 = vmatprep.subr.mxu0 %v1601_v41 }
  0xc4   : > { %v323_v55 = vsel %vm322_vm5, %v319_v47, %v321_v44  ;;  %v324_v56 = vsel %vm322_vm5, %v321_v44, %v319_v47  ;;  %1143 = vmatprep.subr.mxu1 %v1601_v41  ;;  %687 = vmatpush1.msra.mxu0 %v1599_v40 }
  0xc5   : > { %v340_v61 = vmul.f32 %v333_v32, %v324_v56  ;;  %v341_v62 = vmul.f32 %v337_v33, %v323_v55  ;;  %v357_v63 = vadd.f32 %v350_v34, %v324_v56  ;;  %v358_v7 = vadd.f32 %v354_v37, %v323_v55  ;;  %1152 = vmatpush1.msra.mxu1 %v1599_v40 }
  0xc7   : > { %v278_v9 = vpop.permute.xlu1 %277  ;;  %v276_v10 = vpop.permute.xlu0 %275  ;;  %688 = vmatprep.subr.mxu0 %v341_v62  ;;  %1144 = vmatprep.subr.mxu1 %v341_v62 }
  0xc8   : > { %v280_v19 = vsel %vm279_vm6, %v276_v10, %v278_v9  ;;  %v281_v20 = vsel %vm279_vm6, %v278_v9, %v276_v10  ;;  %689 = vmatpush1.msra.mxu0 %v340_v61  ;;  %1153 = vmatpush1.msra.mxu1 %v340_v61 }
  0xc9   : > { %v297_v23 = vmul.f32 %v290_v48, %v281_v20  ;;  %v298_v24 = vmul.f32 %v294_v53, %v280_v19  ;;  %v314_v30 = vadd.f32 %v307_v54, %v281_v20  ;;  %v315_v31 = vadd.f32 %v311_v57, %v280_v19  ;;  %v629_v54 = vld [vmem:[%s1393_s18 + $0x10] sm:$0xff] }
  0xcb   : > { %v234_v32 = vpop.permute.xlu1 %233  ;;  %v232_v33 = vpop.permute.xlu0 %231  ;;  %690 = vmatprep.subr.mxu0 %v298_v24  ;;  %1145 = vmatprep.subr.mxu1 %v298_v24 }
  0xcc   : > { %v238_v34 = vsel %vm237_vm7, %v232_v33, %v234_v32  ;;  %v239_v35 = vsel %vm237_vm7, %v234_v32, %v232_v33  ;;  %691 = vmatpush1.msra.mxu0 %v297_v23  ;;  %1154 = vmatpush1.msra.mxu1 %v297_v23 }
  0xcd   : > { %v254_v36 = vmul.f32 %v247_v13, %v239_v35  ;;  %v255_v37 = vmul.f32 %v251_v17, %v238_v34  ;;  %v271_v38 = vadd.f32 %v264_v18, %v239_v35  ;;  %v272_v16 = vadd.f32 %v268_v21, %v238_v34  ;;  %v630_v18 = vld [vmem:[%s1393_s18 + $0x18] sm:$0xff]  ;;  %s755_s18 = smul.u32 (!%p1097_p5), 20, %s1274_s22 }
  0xcf   : > { %v273_v44 = vmax.f32 %v271_v38, -1e+30  ;;  %v274_v47 = vmax.f32 %v272_v16, -1e+30  ;;  %v301_v48 = vadd.f32 %v297_v23, %v254_v36  ;;  %v302_v53 = vadd.f32 %v298_v24, %v255_v37  ;;  %692 = vmatprep.subr.mxu0 %v255_v37  ;;  %1146 = vmatprep.subr.mxu1 %v255_v37  ;;  %s756_s7 = sadd.s32 (!%p1097_p5), 1, %s755_s18  ;;  %s761_s8 = sadd.s32 (!%p1097_p5), 2, %s755_s18 }
  0xd0   : > { %693 = vmatpush1.msra.mxu0 %v254_v36  ;;  %1155 = vmatpush1.msra.mxu1 %v254_v36  ;;  %s757_s9 = sld [smem:[#allocation5 + %s756_s7]] (!%p1097_p5)  ;;  %s768_s10 = sadd.s32 (!%p1097_p5), 3, %s755_s18 }
  0xd1   : > { %v316_v55 = vmax.f32 %v273_v44, %v314_v30  ;;  %v317_v56 = vmax.f32 %v274_v47, %v315_v31  ;;  %v344_v57 = vadd.f32 %v340_v61, %v301_v48  ;;  %v345_v58 = vadd.f32 %v341_v62, %v302_v53  ;;  %1093 = vmatmul.mubr.msk.f32.vlgmr.msra.gmra.mxu0 %vm649_vm8, %v627_v39  ;;  %s762_s11 = sld [smem:[#allocation5 + %s761_s8]] (!%p1097_p5)  ;;  %s775_s12 = sadd.s32 (!%p1097_p5), 4, %s755_s18 }
  0xd2   : > { %1095 = vmatmul.mubr.msk.f32.vlgmr.msra.gmra.mxu1 %vm649_vm8, %v629_v54  ;;  %732 = vmatprep.mubr.f32.mxu0 %v1299_v14  ;;  %s769_s13 = sld [smem:[#allocation5 + %s768_s10]] (!%p1097_p5) }
  0xd3   : > { %v359_v9 = vmax.f32 %v316_v55, %v357_v63  ;;  %v360_v10 = vmax.f32 %v317_v56, %v358_v7  ;;  %v387_v13 = vadd.f32 %v1599_v40, %v344_v57  ;;  %v388_v17 = vadd.f32 %v1601_v41, %v345_v58  ;;  %744 = vmatprep.mubr.f32.mxu1 %v1299_v14  ;;  %v1092_v40 = vld [vmem:[%s1810_s2 + $0x11] ss:$8 sm:$0x3]  ;;  %s776_s14 = sld [smem:[#allocation5 + %s775_s12]] (!%p1097_p5) }
  0xd4   : > { %v618_v21 = vrot.slane %v1092_v40, %v1425_v11  ;;  %v622_v23 = vrot.slane %v1092_v40, %v1417_v8 }
  0xd5   : > { %v402_v19 = vmax.f32 %v359_v9, %v1603_v42  ;;  %v403_v61 = vmax.f32 %v360_v10, %v1605_v43  ;;  %v423_v62 = vadd.f32 %v1578_v29, %v387_v13  ;;  %v424_v20 = vadd.f32 %v1558_v22, %v388_v17  ;;  %1094 = vmatmul.mubr.msk.f32.gmra.mxu0 %vm649_vm8, %v628_v59 }
  0xd6   : > { %1096 = vmatmul.mubr.msk.f32.gmra.mxu1 %vm649_vm8, %v630_v18 }
  0xd7   : > { %v438_v41 = vmax.f32 %v402_v19, %v1438_v15  ;;  %v439_v14 = vmax.f32 %v403_v61, %v1428_v12  ;;  %v466_v42 = vadd.f32 %v1567_v25, %v423_v62  ;;  %v467_v43 = vadd.f32 %v1569_v26, %v424_v20 }
  0xd9   : > { %v481_v29 = vmax.f32 %v438_v41, %v1571_v27  ;;  %v482_v22 = vmax.f32 %v439_v14, %v1573_v28  ;;  %v509_v63 = vadd.f32 %v1539_v6, %v466_v42  ;;  %v510_v7 = vadd.f32 %v1532_v1, %v467_v43 }
  0xdb   : > { %v524_v15 = vmax.f32 %v481_v29, %v1534_v2  ;;  %v525_v12 = vmax.f32 %v482_v22, %v1536_v3  ;;  %v552_v25 = vadd.f32 %v1530_v0, %v509_v63  ;;  %v553_v26 = vadd.f32 %v1518_v60, %v510_v7 }
  0xdd   : > { %v567_v27 = vmax.f32 %v524_v15, %v1495_v45  ;;  %v568_v28 = vmax.f32 %v525_v12, %v1497_v46  ;;  %v595_v6 = vadd.f32 %v1502_v49, %v552_v25  ;;  %v596_v1 = vadd.f32 %v1504_v50, %v553_v26 }
  0xdf   : > { %v1677_v11 = vmax.f32 %v567_v27, %v1506_v51  ;;  %v1680_v8 = vmax.f32 %v568_v28, %v1508_v52  ;;  %v1682_v2 = vmul.f32 %v618_v21, %v595_v6  ;;  %v1684_v3 = vmul.f32 %v622_v23, %v596_v1 }
 0x191   : > { %v728_v0 = vpop.f32.mrf.mxu0 }
 0x192   : > { %v1686_v60 = vpop.f32.mrf.mxu1 }
 0x193   : > { %v730_v45 = vpop.f32.mrf.mxu0 }
 0x194   : > { %v1688_v24 = vpop.f32.mrf.mxu1  ;;  %754 = sbr.rel (%p1097_p5) target bundleno = 429 (0x1ad), region = 44 }
 0x195   : > { %v1690_v46 = vpop.f32.mrf.mxu0 }
 0x196   : > { %v1692_v49 = vpop.f32.mrf.mxu1 }
 0x197   : > { %v736_v50 = vpop.f32.mrf.mxu0 }
 0x198   : > { %v1694_v51 = vpop.f32.mrf.mxu1 }
 0x199   : > { %v758_v52 = vstv %s757_s9  ;;  %v763_v32 = vstv %s762_s11  ;;  %v770_v35 = vstv %s769_s13  ;;  %v777_v38 = vstv %s776_s14 }
 0x19a   : > { %v759_v30 = vmul.f32 %v758_v52, %v1405_v4  ;;  %v760_v31 = vmul.f32 %v758_v52, %v1409_v5  ;;  %v764_v33 = vmul.f32 %v763_v32, %v728_v0  ;;  %v765_v34 = vmul.f32 %v763_v32, %v730_v45 }
 0x19b   : > { %v771_v36 = vmul.f32 %v770_v35, %v1682_v2  ;;  %v772_v37 = vmul.f32 %v770_v35, %v1684_v3  ;;  %v778_v44 = vmul.f32 %v777_v38, %v1677_v11  ;;  %v779_v47 = vmul.f32 %v777_v38, %v1680_v8 }
 0x19c   : > { %v766_v16 = vadd.f32 %v764_v33, %v759_v30  ;;  %v767_v39 = vadd.f32 %v765_v34, %v760_v31  ;;  %784 = sbr.rel (%p1070_p2) target bundleno = 419 (0x1a3), region = 48 }
 0x19e   : > { %v773_v48 = vadd.f32 %v771_v36, %v766_v16  ;;  %v774_v53 = vadd.f32 %v772_v37, %v767_v39 }
 0x1a0   : > { %v780_v54 = vadd.f32 %v778_v44, %v773_v48  ;;  %v781_v55 = vadd.f32 %v779_v47, %v774_v53 }
 0x1a2   : > { %785 = vst [vmem:[%s1395_s19] sm:$0xff] %v780_v54  ;;  %786 = vst [vmem:[%s1395_s19 + $0x8] sm:$0xff] %v781_v55 }
 0x1a3 PF: > { %789 = sbr.rel (%p1071_p3) target bundleno = 429 (0x1ad), region = 52 }
 0x1a9   : > { %v790_v56 = vld [vmem:[%s1395_s19] sm:$0xff]  ;;  %v791_v57 = vld [vmem:[%s1395_s19 + $0x8] sm:$0xff] }
 0x1aa   : > { %v792_v58 = vadd.f32 %v790_v56, %v780_v54  ;;  %v793_v59 = vadd.f32 %v791_v57, %v781_v55 }
 0x1ac   : > { %794 = vst [vmem:[%s1395_s19] sm:$0xff] %v792_v58  ;;  %795 = vst [vmem:[%s1395_s19 + $0x8] sm:$0xff] %v793_v59 }
 0x1ad PF: > { %p1100_p6 = scmp.gt.s32.totalorder %s1274_s22, 1 }
 0x1ae   : > { %s1101_s15 = sshll.u32 (!%p1100_p6), %s1274_s22, 2 }
 0x1af   : > { %799 = sbr.rel (%p1100_p6) target bundleno = 462 (0x1ce), region = 56  ;;  %s801_s16 = sadd.s32 (!%p1100_p6), 1, %s1101_s15 }
 0x1b0   : > { %s802_s17 = smul.u32 (!%p1100_p6), 5, %s801_s16 }
 0x1b2   : > { %s803_s20 = sadd.s32 (!%p1100_p6), 1, %s802_s17  ;;  %s808_s28 = sadd.s32 (!%p1100_p6), 2, %s802_s17 }
 0x1b3   : > { %s804_s30 = sld [smem:[#allocation5 + %s803_s20]] (!%p1100_p6)  ;;  %s815_s5 = sadd.s32 (!%p1100_p6), 3, %s802_s17 }
 0x1b4   : > { %s809_s18 = sld [smem:[#allocation5 + %s808_s28]]  ;;  %s822_s7 = sadd.s32 4, %s802_s17 }
 0x1b5   : > { %s816_s8 = sld [smem:[#allocation5 + %s815_s5]] }
 0x1b6   : > { %s823_s9 = sld [smem:[#allocation5 + %s822_s7]] }
 0x1b9   : > { %v805_v9 = vstv %s804_s30 }
 0x1ba   : > { %v806_v10 = vmul.f32 %v805_v9, %v1405_v4  ;;  %v807_v13 = vmul.f32 %v805_v9, %v1409_v5  ;;  %v810_v17 = vstv %s809_s18 }
 0x1bb   : > { %v811_v18 = vmul.f32 %v810_v17, %v1690_v46  ;;  %v812_v19 = vmul.f32 %v810_v17, %v736_v50  ;;  %v817_v61 = vstv %s816_s8 }
 0x1bc   : > { %v818_v62 = vmul.f32 %v817_v61, %v1682_v2  ;;  %v819_v20 = vmul.f32 %v817_v61, %v1684_v3  ;;  %v824_v40 = vstv %s823_s9 }
 0x1bd   : > { %v813_v41 = vadd.f32 %v811_v18, %v806_v10  ;;  %v814_v14 = vadd.f32 %v812_v19, %v807_v13  ;;  %v825_v42 = vmul.f32 %v824_v40, %v1677_v11  ;;  %v826_v43 = vmul.f32 %v824_v40, %v1680_v8  ;;  %831 = sbr.rel (%p1070_p2) target bundleno = 452 (0x1c4), region = 60 }
 0x1bf   : > { %v820_v29 = vadd.f32 %v818_v62, %v813_v41  ;;  %v821_v22 = vadd.f32 %v819_v20, %v814_v14 }
 0x1c1   : > { %v827_v63 = vadd.f32 %v825_v42, %v820_v29  ;;  %v828_v7 = vadd.f32 %v826_v43, %v821_v22 }
 0x1c3   : > { %1103 = vst [vmem:[%s1395_s19 + $0x10] sm:$0xff] %v827_v63  ;;  %1104 = vst [vmem:[%s1395_s19 + $0x18] sm:$0xff] %v828_v7 }
 0x1c4 PF: > { %837 = sbr.rel (%p1071_p3) target bundleno = 462 (0x1ce), region = 64 }
 0x1ca   : > { %v1106_v21 = vld [vmem:[%s1395_s19 + $0x10] sm:$0xff]  ;;  %v1107_v23 = vld [vmem:[%s1395_s19 + $0x18] sm:$0xff] }
 0x1cb   : > { %v841_v15 = vadd.f32 %v1106_v21, %v827_v63  ;;  %v842_v12 = vadd.f32 %v1107_v23, %v828_v7 }
 0x1cd   : > { %1108 = vst [vmem:[%s1395_s19 + $0x10] sm:$0xff] %v841_v15  ;;  %1109 = vst [vmem:[%s1395_s19 + $0x18] sm:$0xff] %v842_v12 }
 0x1ce PF: > { %p1110_p7 = scmp.gt.s32.totalorder %s1274_s22, 2 }
 0x1cf   : > { %s1111_s10 = sshll.u32 (!%p1110_p7), %s1274_s22, 2 }
 0x1d0   : > { %848 = sbr.rel (%p1110_p7) target bundleno = 495 (0x1ef), region = 68  ;;  %s850_s11 = sadd.s32 (!%p1110_p7), 2, %s1111_s10 }
 0x1d1   : > { %s851_s12 = smul.u32 (!%p1110_p7), 5, %s850_s11 }
 0x1d3   : > { %s852_s13 = sadd.s32 (!%p1110_p7), 1, %s851_s12  ;;  %s857_s14 = sadd.s32 (!%p1110_p7), 2, %s851_s12 }
 0x1d4   : > { %s853_s15 = sld [smem:[#allocation5 + %s852_s13]] (!%p1110_p7)  ;;  %s864_s16 = sadd.s32 (!%p1110_p7), 3, %s851_s12 }
 0x1d5   : > { %s858_s17 = sld [smem:[#allocation5 + %s857_s14]]  ;;  %s871_s20 = sadd.s32 4, %s851_s12 }
 0x1d6   : > { %s865_s28 = sld [smem:[#allocation5 + %s864_s16]] }
 0x1d7   : > { %s872_s30 = sld [smem:[#allocation5 + %s871_s20]] }
 0x1da   : > { %v854_v25 = vstv %s853_s15 }
 0x1db   : > { %v855_v26 = vmul.f32 %v854_v25, %v1405_v4  ;;  %v856_v27 = vmul.f32 %v854_v25, %v1409_v5  ;;  %v859_v28 = vstv %s858_s17 }
 0x1dc   : > { %v860_v6 = vmul.f32 %v859_v28, %v1686_v60  ;;  %v861_v1 = vmul.f32 %v859_v28, %v1688_v24  ;;  %v866_v0 = vstv %s865_s28 }
 0x1dd   : > { %v867_v45 = vmul.f32 %v866_v0, %v1682_v2  ;;  %v868_v46 = vmul.f32 %v866_v0, %v1684_v3  ;;  %v873_v50 = vstv %s872_s30 }
 0x1de   : > { %v862_v52 = vadd.f32 %v860_v6, %v855_v26  ;;  %v863_v30 = vadd.f32 %v861_v1, %v856_v27  ;;  %v874_v31 = vmul.f32 %v873_v50, %v1677_v11  ;;  %v875_v32 = vmul.f32 %v873_v50, %v1680_v8  ;;  %880 = sbr.rel (%p1070_p2) target bundleno = 485 (0x1e5), region = 72 }
 0x1e0   : > { %v869_v33 = vadd.f32 %v867_v45, %v862_v52  ;;  %v870_v34 = vadd.f32 %v868_v46, %v863_v30 }
 0x1e2   : > { %v876_v35 = vadd.f32 %v874_v31, %v869_v33  ;;  %v877_v36 = vadd.f32 %v875_v32, %v870_v34 }
 0x1e4   : > { %1113 = vst [vmem:[%s1395_s19 + $0x20] sm:$0xff] %v876_v35  ;;  %1114 = vst [vmem:[%s1395_s19 + $0x28] sm:$0xff] %v877_v36 }
 0x1e5 PF: > { %886 = sbr.rel (%p1071_p3) target bundleno = 495 (0x1ef), region = 76 }
 0x1eb   : > { %v1116_v60 = vld [vmem:[%s1395_s19 + $0x20] sm:$0xff]  ;;  %v1117_v24 = vld [vmem:[%s1395_s19 + $0x28] sm:$0xff] }
 0x1ec   : > { %v890_v37 = vadd.f32 %v1116_v60, %v876_v35  ;;  %v891_v38 = vadd.f32 %v1117_v24, %v877_v36 }
 0x1ee   : > { %1118 = vst [vmem:[%s1395_s19 + $0x20] sm:$0xff] %v890_v37  ;;  %1119 = vst [vmem:[%s1395_s19 + $0x28] sm:$0xff] %v891_v38 }
 0x1ef PF: > { %p1120_p8 = scmp.gt.s32.totalorder %s1274_s22, 3 }
 0x1f0   : > { %s1121_s5 = sshll.u32 (!%p1120_p8), %s1274_s22, 2 }
 0x1f1   : > { %897 = sbr.rel (%p1120_p8) target bundleno = 528 (0x210), region = 80  ;;  %s899_s18 = sadd.s32 (!%p1120_p8), 3, %s1121_s5 }
 0x1f2   : > { %s900_s7 = smul.u32 (!%p1120_p8), 5, %s899_s18 }
 0x1f4   : > { %s901_s8 = sadd.s32 (!%p1120_p8), 1, %s900_s7  ;;  %s906_s9 = sadd.s32 (!%p1120_p8), 2, %s900_s7 }
 0x1f5   : > { %s902_s10 = sld [smem:[#allocation5 + %s901_s8]] (!%p1120_p8)  ;;  %s913_s11 = sadd.s32 (!%p1120_p8), 3, %s900_s7 }
 0x1f6   : > { %s907_s12 = sld [smem:[#allocation5 + %s906_s9]]  ;;  %s920_s13 = sadd.s32 4, %s900_s7 }
 0x1f7   : > { %s914_s14 = sld [smem:[#allocation5 + %s913_s11]] }
 0x1f8   : > { %s921_s15 = sld [smem:[#allocation5 + %s920_s13]] }
 0x1fb   : > { %v903_v16 = vstv %s902_s10 }
 0x1fc   : > { %v904_v39 = vmul.f32 %v903_v16, %v1405_v4  ;;  %v905_v44 = vmul.f32 %v903_v16, %v1409_v5  ;;  %v908_v47 = vstv %s907_s12 }
 0x1fd   : > { %v909_v48 = vmul.f32 %v908_v47, %v1692_v49  ;;  %v910_v53 = vmul.f32 %v908_v47, %v1694_v51  ;;  %v915_v54 = vstv %s914_s14 }
 0x1fe   : > { %v916_v55 = vmul.f32 %v915_v54, %v1682_v2  ;;  %v917_v56 = vmul.f32 %v915_v54, %v1684_v3  ;;  %v922_v57 = vstv %s921_s15 }
 0x1ff   : > { %v911_v58 = vadd.f32 %v909_v48, %v904_v39  ;;  %v912_v59 = vadd.f32 %v910_v53, %v905_v44  ;;  %v923_v9 = vmul.f32 %v922_v57, %v1677_v11  ;;  %v924_v10 = vmul.f32 %v922_v57, %v1680_v8  ;;  %929 = sbr.rel (%p1070_p2) target bundleno = 518 (0x206), region = 84 }
 0x201   : > { %v918_v4 = vadd.f32 %v916_v55, %v911_v58  ;;  %v919_v13 = vadd.f32 %v917_v56, %v912_v59 }
 0x203   : > { %v925_v5 = vadd.f32 %v923_v9, %v918_v4  ;;  %v926_v17 = vadd.f32 %v924_v10, %v919_v13 }
 0x205   : > { %1123 = vst [vmem:[%s1395_s19 + $0x30] sm:$0xff] %v925_v5  ;;  %1124 = vst [vmem:[%s1395_s19 + $0x38] sm:$0xff] %v926_v17 }
 0x206 PF: > { %935 = sbr.rel (%p1071_p3) target bundleno = 528 (0x210), region = 88 }
 0x20c   : > { %v1126_v11 = vld [vmem:[%s1395_s19 + $0x30] sm:$0xff]  ;;  %v1127_v8 = vld [vmem:[%s1395_s19 + $0x38] sm:$0xff] }
 0x20d   : > { %v939_v2 = vadd.f32 %v1126_v11, %v925_v5  ;;  %v940_v3 = vadd.f32 %v1127_v8, %v926_v17 }
 0x20f   : > { %1128 = vst [vmem:[%s1395_s19 + $0x30] sm:$0xff] %v939_v2  ;;  %1129 = vst [vmem:[%s1395_s19 + $0x38] sm:$0xff] %v940_v3 }
 0x210 PF: > { %949 = sbr.rel (!%p1372_p11) target bundleno = 536 (0x218), region = 92  ;;  %s1137_s22 = sshll.u32 (%p1372_p11), %s1278_s0, 4  ;;  %v965_v49 = vld [vmem:[%s1395_s19] sm:$0xff] (%p1372_p11)  ;;  %v967_v51 = vld [vmem:[%s1395_s19 + $0x8] sm:$0xff] (%p1372_p11)  ;;  %v969_v18 = vld [vmem:[%s1395_s19 + $0x10] sm:$0xff] (%p1372_p11) }
 0x211   : > { %s952_s20 = scalar_lea.vmem (%p1372_p11), %s1812_s4, %s1137_s22  ;;  %v971_v19 = vld [vmem:[%s1395_s19 + $0x18] sm:$0xff] (%p1372_p11)  ;;  %v973_v61 = vld [vmem:[%s1395_s19 + $0x20] sm:$0xff] (%p1372_p11)  ;;  %v975_v62 = vld [vmem:[%s1395_s19 + $0x28] sm:$0xff] (%p1372_p11) }
 0x212   : > { %966 = vst [vmem:[%s952_s20] sm:$0xff] (%p1372_p11), %v965_v49  ;;  %968 = vst [vmem:[%s952_s20 + $0x8] sm:$0xff] (%p1372_p11), %v967_v51 }
 0x213   : > { %970 = vst [vmem:[%s952_s20 + $0x20] sm:$0xff] (%p1372_p11), %v969_v18  ;;  %972 = vst [vmem:[%s952_s20 + $0x28] sm:$0xff] (%p1372_p11), %v971_v19 }
 0x214   : > { %974 = vst [vmem:[%s952_s20 + $0x40] sm:$0xff] (%p1372_p11), %v973_v61  ;;  %976 = vst [vmem:[%s952_s20 + $0x48] sm:$0xff] (%p1372_p11), %v975_v62 }
 0x216   : > { %v977_v20 = vld [vmem:[%s1395_s19 + $0x30] sm:$0xff]  ;;  %v979_v40 = vld [vmem:[%s1395_s19 + $0x38] sm:$0xff] }
 0x217   : > { %978 = vst [vmem:[%s952_s20 + $0x60] sm:$0xff] %v977_v20  ;;  %980 = vst [vmem:[%s952_s20 + $0x68] sm:$0xff] %v979_v40 }
 0x218 PF: > { %s20_s25 = sadd.s32 1, %s1290_s25   ;;  %s1814_s20 = smov %s1270_s21 }
 0x219   : > { %p17_p9 = scmp.ge.s32.totalorder %s20_s25, 10   ;;  %s1815_s21 = smov %s1382_s6 }
 0x21a   : > { %s1816_s22 = smov %s1282_s23  ;;  %s1817_s0 = smov %s1286_s24 }
 0x21b   : > { %s1818_s23 = smov %s1821_s26  ;;  %s1819_s24 = smov %s1825_s27 }
 0x21c   :  { %19 = sbr.rel (!%p17_p9) target bundleno = 19 (0x13), region = 169 }

</bundles_post_ra>
